<compile_context>
chip_gen: v7x
topology: tpu7x:2x2x1
jax: 0.10.0
libtpu: 0.0.40
codegen_flags: <defaults>
</compile_context>

<pallas_src>
import functools

import numpy as np

import jax
import jax.numpy as jnp
from jax.experimental import pallas as pl
from jax.experimental.pallas import tpu as pltpu


# --------------------------------------------------------------------------
# Static helpers
# --------------------------------------------------------------------------

def _tap_masks(H, W):
    """(9, H*W) 0/1 validity masks. Tap t = (dh+1)*3 + (dw+1), dh,dw in {-1,0,1}."""
    HW = H * W
    p = np.arange(HW)
    hh, ww = p // W, p % W
    m = np.zeros((9, HW), np.float32)
    for t in range(9):
        dh, dw = t // 3 - 1, t % 3 - 1
        valid = (hh + dh >= 0) & (hh + dh < H) & (ww + dw >= 0) & (ww + dw < W)
        m[t] = valid.astype(np.float32)
    return m


def _device_prefs():
    """(prefer_steps, vmem_budget_bytes) per generation; safe fallback on CPU."""
    try:
        kind = jax.devices()[0].device_kind.lower()
    except Exception:
        kind = ""
    if "v7" in kind:
        # 2 TensorCores, 64 MiB VMEM per TC -> keep >= 2 grid steps, tighter budget.
        return 2, 40 << 20
    # v5e / v6e (or CPU interpret): single TC, 128 MiB VMEM.
    return 1, 80 << 20


def _tile_vmem_bytes(t, F, HW):
    """Rough per-step VMEM: in/out blocks (double-buffered), mask, im2col patch,
    activations, segment matrix — all f32."""
    L = t * HW
    return 4 * L * (2 * 2 * F     # x + out blocks, double-buffered
                    + 2 * 9 * F   # mask block (worst-case double-buffered)
                    + 9 * F       # im2col patch
                    + 2 * F       # y1, y2
                    + 2 * t)      # segment matrix


def _pick_tile_n(N, F, HW, prefer_steps, vmem_budget):
    divisors = [d for d in range(1, N + 1) if N % d == 0]
    fit = [d for d in divisors if _tile_vmem_bytes(d, F, HW) <= vmem_budget] or [1]
    # Prefer: enough grid steps (v7x), lane-dense tiles (tile_n*HW % 128 == 0), size.
    return max(fit, key=lambda d: ((N // d) >= prefer_steps, (d * HW) % 128 == 0, d))


# --------------------------------------------------------------------------
# Fused kernel: DoubleConv + channel attention + residual for one image tile
# --------------------------------------------------------------------------

def _layer_kernel(x_ref, pe_ref, mask_ref, seg_ref, wc_ref, bc_ref,
                  se1_ref, se2_ref, o_ref, *, F, Fr, W, HW, tile_n):
    inv_hw = 1.0 / float(HW)

    x = x_ref[...]                      # (F, L)   f32, L = tile_n*HW (lane-dense)
    mask = mask_ref[...]                # (9F, L)  0/1, pre-broadcast per tap
    seg = seg_ref[...]                  # (tile_n, L)  block-diagonal ones
    wc = wc_ref[...]                    # (2F, 9F) conv weights (im2col layout)
    w1, w2 = wc[:F, :], wc[F:, :]
    bc = bc_ref[...]                    # (F, 2)   conv biases
    b1, b2 = bc[:, 0:1], bc[:, 1:2]
    se1 = se1_ref[...]                  # (Fr, F+1)  [aw1^T | ab1]
    aw1t, ab1 = se1[:, :F], se1[:, F:F + 1]
    se2 = se2_ref[...]                  # (F, Fr+1)  [aw2^T | ab2]
    aw2t, ab2 = se2[:, :Fr], se2[:, Fr:Fr + 1]

    # Tap shifts (static). Rolling the whole lane-concatenated tile is safe:
    # any cross-image / wrap-around leakage lands on masked (zeroed) positions.
    shifts = tuple((t // 3 - 1) * W + (t % 3 - 1) for t in range(9))

    def im2col(img):
        rows = [img if s == 0 else jnp.roll(img, -s, axis=1) for s in shifts]
        return jnp.concatenate(rows, axis=0) * mask          # (9F, L)

    # conv1 -> ReLU -> conv2, one batched im2col matmul each (f32 on the MXU).
    y1 = jnp.dot(w1, im2col(x), preferred_element_type=jnp.float32) + b1
    y1 = jnp.maximum(y1, 0.0)
    y2 = jnp.dot(w2, im2col(y1), preferred_element_type=jnp.float32) + b2

    # Global average pool per image via the segment matrix (MXU, no relayout).
    pooled = jax.lax.dot_general(y2, seg, (((1,), (1,)), ((), ())),
                                 preferred_element_type=jnp.float32) * inv_hw
    pooled = pooled + pe_ref[...]                            # (F, tile_n)

    # Squeeze/excite MLP, batched over the tile.
    h = jnp.maximum(
        jnp.dot(aw1t, pooled, preferred_element_type=jnp.float32) + ab1, 0.0)
    gate = jax.nn.sigmoid(
        jnp.dot(aw2t, h, preferred_element_type=jnp.float32) + ab2)  # (F, tile_n)

    # Broadcast the gate back to lanes and fuse rescale + residual.
    gate_l = jnp.dot(gate, seg, preferred_element_type=jnp.float32)  # (F, L)
    o_ref[...] = (y2 * gate_l + x).astype(o_ref.dtype)


# --------------------------------------------------------------------------
# Wrapper
# --------------------------------------------------------------------------

@jax.jit
def layer_forward(x, params):
    """x: (B, channels, n_feats, H, W) -> same shape."""
    B, C, F, H, W = x.shape
    N, HW = B * C, H * W
    Fr = params["aw1"].shape[1]

    prefer_steps, vmem_budget = _device_prefs()
    tile_n = _pick_tile_n(N, F, HW, prefer_steps, vmem_budget)
    num_tiles = N // tile_n
    L = tile_n * HW
    vmem_limit = int(min(vmem_budget, max(8 << 20, 2 * _tile_vmem_bytes(tile_n, F, HW))))

    # Lane-dense layout: images of a tile concatenated on the lane axis.
    x_t = (x.reshape(num_tiles, tile_n, F, HW)
            .transpose(0, 2, 1, 3)
            .reshape(num_tiles * F, L))

    # Constants (pre-broadcast mask, pooling/broadcast segment matrix).
    big_mask = jnp.asarray(
        np.repeat(np.tile(_tap_masks(H, W), (1, tile_n)), F, axis=0))   # (9F, L)
    seg = jnp.asarray(
        np.kron(np.eye(tile_n, dtype=np.float32),
                np.ones((1, HW), np.float32)))                          # (tile_n, L)

    # Packed parameters (fewer operands / DMA descriptors per step).
    wc = jnp.concatenate(
        [jnp.transpose(params["c1w"], (2, 0, 1)).reshape(F, 9 * F),
         jnp.transpose(params["c2w"], (2, 0, 1)).reshape(F, 9 * F)], axis=0)  # (2F, 9F)
    bconv = jnp.concatenate(
        [params["c1b"].reshape(F, 1), params["c2b"].reshape(F, 1)], axis=1)   # (F, 2)
    se1 = jnp.concatenate(
        [params["aw1"].T, params["ab1"].reshape(Fr, 1)], axis=1)              # (Fr, F+1)
    se2 = jnp.concatenate(
        [params["aw2"].T, params["ab2"].reshape(F, 1)], axis=1)               # (F, Fr+1)

    # Per-image positional embedding, arranged per tile: (num_tiles*F, tile_n).
    pe_imgs = jnp.tile(params["pe"], (B, 1))                                  # (N, F)
    pe_blk = (pe_imgs.reshape(num_tiles, tile_n, F)
                     .transpose(0, 2, 1)
                     .reshape(num_tiles * F, tile_n))

    kern = functools.partial(_layer_kernel, F=F, Fr=Fr, W=W, HW=HW, tile_n=tile_n)

    def const_spec(shape):
        return pl.BlockSpec(shape, lambda i: (0,) * len(shape))

    out_t = pl.pallas_call(
        kern,
        out_shape=jax.ShapeDtypeStruct((num_tiles * F, L), x.dtype),
        grid=(num_tiles,),
        in_specs=[
            pl.BlockSpec((F, L), lambda i: (i, 0)),        # x tile (lane-dense)
            pl.BlockSpec((F, tile_n), lambda i: (i, 0)),   # pos-embed tile
            const_spec((9 * F, L)),                        # pre-broadcast tap masks
            const_spec((tile_n, L)),                       # segment (pool/broadcast)
            const_spec((2 * F, 9 * F)),                    # conv1|conv2 weights
            const_spec((F, 2)),                            # conv biases
            const_spec((Fr, F + 1)),                       # SE W1^T | b1
            const_spec((F, Fr + 1)),                       # SE W2^T | b2
        ],
        out_specs=pl.BlockSpec((F, L), lambda i: (i, 0)),
        compiler_params=pltpu.CompilerParams(
            dimension_semantics=("parallel",),
            vmem_limit_bytes=vmem_limit,
        ),
    )(x_t, pe_blk, big_mask, seg, wc, bconv, se1, se2)

    return (out_t.reshape(num_tiles, F, tile_n, HW)
                 .transpose(0, 2, 1, 3)
                 .reshape(B, C, F, H, W))


# --------------------------------------------------------------------------
# Parameters & pure-JAX reference
# --------------------------------------------------------------------------

def init_params(key, channels, n_feats, reduction=4):
    ks = jax.random.split(key, 7)
    F, Fr = n_feats, n_feats // reduction
    s = 0.1
    return {
        "c1w": s * jax.random.normal(ks[0], (9, F, F), jnp.float32),   # (tap, Fin, Fout)
        "c1b": s * jax.random.normal(ks[1], (1, F), jnp.float32),
        "c2w": s * jax.random.normal(ks[2], (9, F, F), jnp.float32),
        "c2b": s * jax.random.normal(ks[3], (1, F), jnp.float32),
        "pe":  s * jax.random.normal(ks[4], (channels, F), jnp.float32),
        "aw1": s * jax.random.normal(ks[5], (F, Fr), jnp.float32),
        "ab1": jnp.zeros((1, Fr), jnp.float32),
        "aw2": s * jax.random.normal(ks[6], (Fr, F), jnp.float32),
        "ab2": jnp.zeros((1, F), jnp.float32),
    }


def reference_forward(x, p):
    """Pure-JAX f32 reference with identical math."""
    B, C, F, H, W = x.shape
    N = B * C
    xr = x.reshape(N, F, H, W).astype(jnp.float32)

    def conv(z, w9, b, relu):
        zp = jnp.pad(z, ((0, 0), (0, 0), (1, 1), (1, 1)))
        out = jnp.zeros((N, F, H, W), jnp.float32)
        for t in range(9):
            dh, dw = t // 3, t % 3
            patch = zp[:, :, dh:dh + H, dw:dw + W]
            out = out + jnp.einsum("nfhw,fg->nghw", patch, w9[t])
        out = out + b.reshape(1, F, 1, 1)
        return jnp.maximum(out, 0.0) if relu else out

    y = conv(xr, p["c1w"], p["c1b"], True)
    y = conv(y, p["c2w"], p["c2b"], False)
    pooled = y.mean(axis=(2, 3)) + jnp.tile(p["pe"], (B, 1))        # (N, F)
    h = jnp.maximum(pooled @ p["aw1"] + p["ab1"], 0.0)
    s = jax.nn.sigmoid(h @ p["aw2"] + p["ab2"])
    out = y * s[:, :, None, None] + xr
    return out.reshape(B, C, F, H, W)


# --------------------------------------------------------------------------

if __name__ == "__main__":
    B, C, F, H, W = 2, 4, 16, 8, 8            # batch, channels, n_feats, spatial
    key = jax.random.PRNGKey(0)
    kx, kp = jax.random.split(key)
    x = jax.random.normal(kx, (B, C, F, H, W), jnp.float32)
    params = init_params(kp, C, F, reduction=4)

    out = jax.block_until_ready(layer_forward(x, params))
    ref = jax.block_until_ready(reference_forward(x, params))

    assert out.shape == x.shape
    # Both paths are f32; tolerance only needs to absorb MXU summation-order /
    # default-precision differences between the Pallas and XLA matmul paths.
    np.testing.assert_allclose(np.asarray(out), np.asarray(ref),
                               rtol=2e-2, atol=2e-2)
    print("KERNEL_OK")
</pallas_src>

<mosaic_0001>
module attributes {stable_mosaic.version = 11 : i64} {
  func.func @_layer_kernel(%arg0: i32, %arg1: memref<16x512xf32, #tpu.memory_space<vmem>>, %arg2: memref<16x8xf32, #tpu.memory_space<vmem>>, %arg3: memref<144x512xf32, #tpu.memory_space<vmem>>, %arg4: memref<8x512xf32, #tpu.memory_space<vmem>>, %arg5: memref<32x144xf32, #tpu.memory_space<vmem>>, %arg6: memref<16x2xf32, #tpu.memory_space<vmem>>, %arg7: memref<4x17xf32, #tpu.memory_space<vmem>>, %arg8: memref<16x5xf32, #tpu.memory_space<vmem>>, %arg9: memref<16x512xf32, #tpu.memory_space<vmem>>) attributes {dimension_semantics = [#tpu.dimension_semantics<parallel>], iteration_bounds = array<i64: 1>, scalar_prefetch = 0 : i64, scratch_operands = 0 : i64, tpu.core_type = #tpu.core_type<tc>, window_params = [{transform_indices = @transform_0, window_bounds = array<i64: 16, 512>}, {transform_indices = @transform_1, window_bounds = array<i64: 16, 8>}, {pipeline_mode = #tpu.pipeline_mode<synchronous>, transform_indices = @transform_2, window_bounds = array<i64: 144, 512>}, {pipeline_mode = #tpu.pipeline_mode<synchronous>, transform_indices = @transform_3, window_bounds = array<i64: 8, 512>}, {pipeline_mode = #tpu.pipeline_mode<synchronous>, transform_indices = @transform_4, window_bounds = array<i64: 32, 144>}, {pipeline_mode = #tpu.pipeline_mode<synchronous>, transform_indices = @transform_5, window_bounds = array<i64: 16, 2>}, {pipeline_mode = #tpu.pipeline_mode<synchronous>, transform_indices = @transform_6, window_bounds = array<i64: 4, 17>}, {pipeline_mode = #tpu.pipeline_mode<synchronous>, transform_indices = @transform_7, window_bounds = array<i64: 16, 5>}, {transform_indices = @transform_8, window_bounds = array<i64: 16, 512>}]} {
    %c0 = arith.constant 0 : index
    %c0_0 = arith.constant 0 : index
    %0 = vector.load %arg1[%c0, %c0_0] : memref<16x512xf32, #tpu.memory_space<vmem>>, vector<16x512xf32>
    %c0_1 = arith.constant 0 : index
    %c0_2 = arith.constant 0 : index
    %1 = vector.load %arg3[%c0_1, %c0_2] : memref<144x512xf32, #tpu.memory_space<vmem>>, vector<144x512xf32>
    %c0_3 = arith.constant 0 : index
    %c0_4 = arith.constant 0 : index
    %2 = vector.load %arg4[%c0_3, %c0_4] : memref<8x512xf32, #tpu.memory_space<vmem>>, vector<8x512xf32>
    %c0_5 = arith.constant 0 : index
    %c0_6 = arith.constant 0 : index
    %3 = vector.load %arg5[%c0_5, %c0_6] : memref<32x144xf32, #tpu.memory_space<vmem>>, vector<32x144xf32>
    %4 = vector.extract_strided_slice %3 {offsets = [0, 0], sizes = [16, 144], strides = [1, 1]} : vector<32x144xf32> to vector<16x144xf32>
    %5 = vector.extract_strided_slice %3 {offsets = [16, 0], sizes = [16, 144], strides = [1, 1]} : vector<32x144xf32> to vector<16x144xf32>
    %c0_7 = arith.constant 0 : index
    %c0_8 = arith.constant 0 : index
    %6 = vector.load %arg6[%c0_7, %c0_8] : memref<16x2xf32, #tpu.memory_space<vmem>>, vector<16x2xf32>
    %7 = vector.extract_strided_slice %6 {offsets = [0, 0], sizes = [16, 1], strides = [1, 1]} : vector<16x2xf32> to vector<16x1xf32>
    %8 = vector.extract_strided_slice %6 {offsets = [0, 1], sizes = [16, 1], strides = [1, 1]} : vector<16x2xf32> to vector<16x1xf32>
    %c0_9 = arith.constant 0 : index
    %c0_10 = arith.constant 0 : index
    %9 = vector.load %arg7[%c0_9, %c0_10] : memref<4x17xf32, #tpu.memory_space<vmem>>, vector<4x17xf32>
    %10 = vector.extract_strided_slice %9 {offsets = [0, 0], sizes = [4, 16], strides = [1, 1]} : vector<4x17xf32> to vector<4x16xf32>
    %11 = vector.extract_strided_slice %9 {offsets = [0, 16], sizes = [4, 1], strides = [1, 1]} : vector<4x17xf32> to vector<4x1xf32>
    %c0_11 = arith.constant 0 : index
    %c0_12 = arith.constant 0 : index
    %12 = vector.load %arg8[%c0_11, %c0_12] : memref<16x5xf32, #tpu.memory_space<vmem>>, vector<16x5xf32>
    %13 = vector.extract_strided_slice %12 {offsets = [0, 0], sizes = [16, 4], strides = [1, 1]} : vector<16x5xf32> to vector<16x4xf32>
    %14 = vector.extract_strided_slice %12 {offsets = [0, 4], sizes = [16, 1], strides = [1, 1]} : vector<16x5xf32> to vector<16x1xf32>
    %15 = vector.extract_strided_slice %0 {offsets = [0, 503], sizes = [16, 9], strides = [1, 1]} : vector<16x512xf32> to vector<16x9xf32>
    %16 = vector.extract_strided_slice %0 {offsets = [0, 0], sizes = [16, 503], strides = [1, 1]} : vector<16x512xf32> to vector<16x503xf32>
    %17 = tpu.concatenate %15, %16 in 1 : vector<16x9xf32>, vector<16x503xf32> -> vector<16x512xf32>
    %18 = vector.extract_strided_slice %0 {offsets = [0, 504], sizes = [16, 8], strides = [1, 1]} : vector<16x512xf32> to vector<16x8xf32>
    %19 = vector.extract_strided_slice %0 {offsets = [0, 0], sizes = [16, 504], strides = [1, 1]} : vector<16x512xf32> to vector<16x504xf32>
    %20 = tpu.concatenate %18, %19 in 1 : vector<16x8xf32>, vector<16x504xf32> -> vector<16x512xf32>
    %21 = vector.extract_strided_slice %0 {offsets = [0, 505], sizes = [16, 7], strides = [1, 1]} : vector<16x512xf32> to vector<16x7xf32>
    %22 = vector.extract_strided_slice %0 {offsets = [0, 0], sizes = [16, 505], strides = [1, 1]} : vector<16x512xf32> to vector<16x505xf32>
    %23 = tpu.concatenate %21, %22 in 1 : vector<16x7xf32>, vector<16x505xf32> -> vector<16x512xf32>
    %24 = vector.extract_strided_slice %0 {offsets = [0, 511], sizes = [16, 1], strides = [1, 1]} : vector<16x512xf32> to vector<16x1xf32>
    %25 = vector.extract_strided_slice %0 {offsets = [0, 0], sizes = [16, 511], strides = [1, 1]} : vector<16x512xf32> to vector<16x511xf32>
    %26 = tpu.concatenate %24, %25 in 1 : vector<16x1xf32>, vector<16x511xf32> -> vector<16x512xf32>
    %27 = vector.extract_strided_slice %0 {offsets = [0, 1], sizes = [16, 511], strides = [1, 1]} : vector<16x512xf32> to vector<16x511xf32>
    %28 = vector.extract_strided_slice %0 {offsets = [0, 0], sizes = [16, 1], strides = [1, 1]} : vector<16x512xf32> to vector<16x1xf32>
    %29 = tpu.concatenate %27, %28 in 1 : vector<16x511xf32>, vector<16x1xf32> -> vector<16x512xf32>
    %30 = vector.extract_strided_slice %0 {offsets = [0, 7], sizes = [16, 505], strides = [1, 1]} : vector<16x512xf32> to vector<16x505xf32>
    %31 = vector.extract_strided_slice %0 {offsets = [0, 0], sizes = [16, 7], strides = [1, 1]} : vector<16x512xf32> to vector<16x7xf32>
    %32 = tpu.concatenate %30, %31 in 1 : vector<16x505xf32>, vector<16x7xf32> -> vector<16x512xf32>
    %33 = vector.extract_strided_slice %0 {offsets = [0, 8], sizes = [16, 504], strides = [1, 1]} : vector<16x512xf32> to vector<16x504xf32>
    %34 = vector.extract_strided_slice %0 {offsets = [0, 0], sizes = [16, 8], strides = [1, 1]} : vector<16x512xf32> to vector<16x8xf32>
    %35 = tpu.concatenate %33, %34 in 1 : vector<16x504xf32>, vector<16x8xf32> -> vector<16x512xf32>
    %36 = vector.extract_strided_slice %0 {offsets = [0, 9], sizes = [16, 503], strides = [1, 1]} : vector<16x512xf32> to vector<16x503xf32>
    %37 = vector.extract_strided_slice %0 {offsets = [0, 0], sizes = [16, 9], strides = [1, 1]} : vector<16x512xf32> to vector<16x9xf32>
    %38 = tpu.concatenate %36, %37 in 1 : vector<16x503xf32>, vector<16x9xf32> -> vector<16x512xf32>
    %39 = tpu.concatenate %17, %20, %23, %26, %0, %29, %32, %35, %38 in 0 : vector<16x512xf32>, vector<16x512xf32>, vector<16x512xf32>, vector<16x512xf32>, vector<16x512xf32>, vector<16x512xf32>, vector<16x512xf32>, vector<16x512xf32>, vector<16x512xf32> -> vector<144x512xf32>
    %40 = arith.mulf %39, %1 : vector<144x512xf32>
    %cst = arith.constant dense<0.000000e+00> : vector<16x512xf32>
    %41 = tpu.matmul %4, %40, %cst {dimension_numbers = #tpu.dot_dimension_numbers<[1], [0], [0], [1], [0, 0, 1, 1], [], []>} : vector<16x144xf32>, vector<144x512xf32>, vector<16x512xf32> -> vector<16x512xf32>
    %42 = vector.broadcast %7 : vector<16x1xf32> to vector<16x512xf32>
    %43 = arith.addf %41, %42 : vector<16x512xf32>
    %cst_13 = arith.constant 0.000000e+00 : f32
    %44 = vector.broadcast %cst_13 : f32 to vector<16x512xf32>
    %45 = arith.maximumf %43, %44 : vector<16x512xf32>
    %46 = vector.extract_strided_slice %45 {offsets = [0, 503], sizes = [16, 9], strides = [1, 1]} : vector<16x512xf32> to vector<16x9xf32>
    %47 = vector.extract_strided_slice %45 {offsets = [0, 0], sizes = [16, 503], strides = [1, 1]} : vector<16x512xf32> to vector<16x503xf32>
    %48 = tpu.concatenate %46, %47 in 1 : vector<16x9xf32>, vector<16x503xf32> -> vector<16x512xf32>
    %49 = vector.extract_strided_slice %45 {offsets = [0, 504], sizes = [16, 8], strides = [1, 1]} : vector<16x512xf32> to vector<16x8xf32>
    %50 = vector.extract_strided_slice %45 {offsets = [0, 0], sizes = [16, 504], strides = [1, 1]} : vector<16x512xf32> to vector<16x504xf32>
    %51 = tpu.concatenate %49, %50 in 1 : vector<16x8xf32>, vector<16x504xf32> -> vector<16x512xf32>
    %52 = vector.extract_strided_slice %45 {offsets = [0, 505], sizes = [16, 7], strides = [1, 1]} : vector<16x512xf32> to vector<16x7xf32>
    %53 = vector.extract_strided_slice %45 {offsets = [0, 0], sizes = [16, 505], strides = [1, 1]} : vector<16x512xf32> to vector<16x505xf32>
    %54 = tpu.concatenate %52, %53 in 1 : vector<16x7xf32>, vector<16x505xf32> -> vector<16x512xf32>
    %55 = vector.extract_strided_slice %45 {offsets = [0, 511], sizes = [16, 1], strides = [1, 1]} : vector<16x512xf32> to vector<16x1xf32>
    %56 = vector.extract_strided_slice %45 {offsets = [0, 0], sizes = [16, 511], strides = [1, 1]} : vector<16x512xf32> to vector<16x511xf32>
    %57 = tpu.concatenate %55, %56 in 1 : vector<16x1xf32>, vector<16x511xf32> -> vector<16x512xf32>
    %58 = vector.extract_strided_slice %45 {offsets = [0, 1], sizes = [16, 511], strides = [1, 1]} : vector<16x512xf32> to vector<16x511xf32>
    %59 = vector.extract_strided_slice %45 {offsets = [0, 0], sizes = [16, 1], strides = [1, 1]} : vector<16x512xf32> to vector<16x1xf32>
    %60 = tpu.concatenate %58, %59 in 1 : vector<16x511xf32>, vector<16x1xf32> -> vector<16x512xf32>
    %61 = vector.extract_strided_slice %45 {offsets = [0, 7], sizes = [16, 505], strides = [1, 1]} : vector<16x512xf32> to vector<16x505xf32>
    %62 = vector.extract_strided_slice %45 {offsets = [0, 0], sizes = [16, 7], strides = [1, 1]} : vector<16x512xf32> to vector<16x7xf32>
    %63 = tpu.concatenate %61, %62 in 1 : vector<16x505xf32>, vector<16x7xf32> -> vector<16x512xf32>
    %64 = vector.extract_strided_slice %45 {offsets = [0, 8], sizes = [16, 504], strides = [1, 1]} : vector<16x512xf32> to vector<16x504xf32>
    %65 = vector.extract_strided_slice %45 {offsets = [0, 0], sizes = [16, 8], strides = [1, 1]} : vector<16x512xf32> to vector<16x8xf32>
    %66 = tpu.concatenate %64, %65 in 1 : vector<16x504xf32>, vector<16x8xf32> -> vector<16x512xf32>
    %67 = vector.extract_strided_slice %45 {offsets = [0, 9], sizes = [16, 503], strides = [1, 1]} : vector<16x512xf32> to vector<16x503xf32>
    %68 = vector.extract_strided_slice %45 {offsets = [0, 0], sizes = [16, 9], strides = [1, 1]} : vector<16x512xf32> to vector<16x9xf32>
    %69 = tpu.concatenate %67, %68 in 1 : vector<16x503xf32>, vector<16x9xf32> -> vector<16x512xf32>
    %70 = tpu.concatenate %48, %51, %54, %57, %45, %60, %63, %66, %69 in 0 : vector<16x512xf32>, vector<16x512xf32>, vector<16x512xf32>, vector<16x512xf32>, vector<16x512xf32>, vector<16x512xf32>, vector<16x512xf32>, vector<16x512xf32>, vector<16x512xf32> -> vector<144x512xf32>
    %71 = arith.mulf %70, %1 : vector<144x512xf32>
    %cst_14 = arith.constant dense<0.000000e+00> : vector<16x512xf32>
    %72 = tpu.matmul %5, %71, %cst_14 {dimension_numbers = #tpu.dot_dimension_numbers<[1], [0], [0], [1], [0, 0, 1, 1], [], []>} : vector<16x144xf32>, vector<144x512xf32>, vector<16x512xf32> -> vector<16x512xf32>
    %73 = vector.broadcast %8 : vector<16x1xf32> to vector<16x512xf32>
    %74 = arith.addf %72, %73 : vector<16x512xf32>
    %cst_15 = arith.constant dense<0.000000e+00> : vector<16x8xf32>
    %75 = tpu.matmul %74, %2, %cst_15 {dimension_numbers = #tpu.dot_dimension_numbers<[1], [1], [0], [0], [0, 0, 1, 0], [], []>} : vector<16x512xf32>, vector<8x512xf32>, vector<16x8xf32> -> vector<16x8xf32>
    %cst_16 = arith.constant 1.562500e-02 : f32
    %76 = vector.broadcast %cst_16 : f32 to vector<16x8xf32>
    %77 = arith.mulf %75, %76 : vector<16x8xf32>
    %c0_17 = arith.constant 0 : index
    %c0_18 = arith.constant 0 : index
    %78 = vector.load %arg2[%c0_17, %c0_18] : memref<16x8xf32, #tpu.memory_space<vmem>>, vector<16x8xf32>
    %79 = arith.addf %77, %78 : vector<16x8xf32>
    %cst_19 = arith.constant dense<0.000000e+00> : vector<4x8xf32>
    %80 = tpu.matmul %10, %79, %cst_19 {dimension_numbers = #tpu.dot_dimension_numbers<[1], [0], [0], [1], [0, 0, 1, 1], [], []>} : vector<4x16xf32>, vector<16x8xf32>, vector<4x8xf32> -> vector<4x8xf32>
    %81 = vector.broadcast %11 : vector<4x1xf32> to vector<4x8xf32>
    %82 = arith.addf %80, %81 : vector<4x8xf32>
    %cst_20 = arith.constant 0.000000e+00 : f32
    %83 = vector.broadcast %cst_20 : f32 to vector<4x8xf32>
    %84 = arith.maximumf %82, %83 : vector<4x8xf32>
    %cst_21 = arith.constant dense<0.000000e+00> : vector<16x8xf32>
    %85 = tpu.matmul %13, %84, %cst_21 {dimension_numbers = #tpu.dot_dimension_numbers<[1], [0], [0], [1], [0, 0, 1, 1], [], []>} : vector<16x4xf32>, vector<4x8xf32>, vector<16x8xf32> -> vector<16x8xf32>
    %86 = vector.broadcast %14 : vector<16x1xf32> to vector<16x8xf32>
    %87 = arith.addf %85, %86 : vector<16x8xf32>
    %88 = arith.negf %87 : vector<16x8xf32>
    %89 = math.exp %88 : vector<16x8xf32>
    %cst_22 = arith.constant 1.000000e+00 : f32
    %90 = vector.broadcast %cst_22 : f32 to vector<16x8xf32>
    %91 = arith.addf %90, %89 : vector<16x8xf32>
    %92 = arith.divf %90, %91 : vector<16x8xf32>
    %cst_23 = arith.constant dense<0.000000e+00> : vector<16x512xf32>
    %93 = tpu.matmul %92, %2, %cst_23 {dimension_numbers = #tpu.dot_dimension_numbers<[1], [0], [0], [1], [0, 0, 1, 1], [], []>} : vector<16x8xf32>, vector<8x512xf32>, vector<16x512xf32> -> vector<16x512xf32>
    %94 = arith.mulf %74, %93 : vector<16x512xf32>
    %95 = arith.addf %94, %0 : vector<16x512xf32>
    %c0_24 = arith.constant 0 : index
    %c0_25 = arith.constant 0 : index
    %96 = vector.load %arg9[%c0_24, %c0_25] : memref<16x512xf32, #tpu.memory_space<vmem>>, vector<16x512xf32>
    tpu.vector_store %arg9[%c0_24, %c0_25], %95 {strides = array<i32>} : memref<16x512xf32, #tpu.memory_space<vmem>>, vector<16x512xf32>,
    return
  }
  func.func @transform_0(%arg0: i32) -> (i32, i32) {
    %c0_i32 = arith.constant 0 : i32
    %c0_i32_0 = arith.constant 0 : i32
    return %arg0, %c0_i32 : i32, i32
  }
  func.func @transform_1(%arg0: i32) -> (i32, i32) {
    %c0_i32 = arith.constant 0 : i32
    %c0_i32_0 = arith.constant 0 : i32
    return %arg0, %c0_i32 : i32, i32
  }
  func.func @transform_2(%arg0: i32) -> (i32, i32) {
    %c0_i32 = arith.constant 0 : i32
    %c0_i32_0 = arith.constant 0 : i32
    %c0_i32_1 = arith.constant 0 : i32
    return %c0_i32, %c0_i32_0 : i32, i32
  }
  func.func @transform_3(%arg0: i32) -> (i32, i32) {
    %c0_i32 = arith.constant 0 : i32
    %c0_i32_0 = arith.constant 0 : i32
    %c0_i32_1 = arith.constant 0 : i32
    return %c0_i32, %c0_i32_0 : i32, i32
  }
  func.func @transform_4(%arg0: i32) -> (i32, i32) {
    %c0_i32 = arith.constant 0 : i32
    %c0_i32_0 = arith.constant 0 : i32
    %c0_i32_1 = arith.constant 0 : i32
    return %c0_i32, %c0_i32_0 : i32, i32
  }
  func.func @transform_5(%arg0: i32) -> (i32, i32) {
    %c0_i32 = arith.constant 0 : i32
    %c0_i32_0 = arith.constant 0 : i32
    %c0_i32_1 = arith.constant 0 : i32
    return %c0_i32, %c0_i32_0 : i32, i32
  }
  func.func @transform_6(%arg0: i32) -> (i32, i32) {
    %c0_i32 = arith.constant 0 : i32
    %c0_i32_0 = arith.constant 0 : i32
    %c0_i32_1 = arith.constant 0 : i32
    return %c0_i32, %c0_i32_0 : i32, i32
  }
  func.func @transform_7(%arg0: i32) -> (i32, i32) {
    %c0_i32 = arith.constant 0 : i32
    %c0_i32_0 = arith.constant 0 : i32
    %c0_i32_1 = arith.constant 0 : i32
    return %c0_i32, %c0_i32_0 : i32, i32
  }
  func.func @transform_8(%arg0: i32) -> (i32, i32) {
    %c0_i32 = arith.constant 0 : i32
    %c0_i32_0 = arith.constant 0 : i32
    return %arg0, %c0_i32 : i32, i32
  }
}

</mosaic_0001>

<bundles_post_ra>
// kernel: layer_forward.1
= control target key start
LH: loop header
LB: loop body
LE: loop exit
PB: predicated region body
PF: predicated region fallthrough
CT: control target
= control target key end

     0   :  { %s1943_s9 = smov 9   ;;  %s1944_s22 = smov 8   ;;  %vm152_vm0 = vcmask 72704   ;;  %vm496_vm1 = vcmask 130048   ;;  %v1951_v32 = vmov 0   ;;  %vm187_vm2 = vcmask 64512   ;;  %s3280_s0 = inlined_call_operand.vmem [shape: f32[16,512], index: 0, kind: input, shape index: {}]   ;;  %s3281_s2 = inlined_call_operand.vmem [shape: f32[144,512], index: 2, kind: input, shape index: {}]   ;;  %s3282_s4 = inlined_call_operand.vmem [shape: f32[32,144], index: 4, kind: input, shape index: {}]   ;;  %s3283_s5 = inlined_call_operand.vmem [shape: f32[16,2], index: 5, kind: input, shape index: {}]   ;;  %s3284_s3 = inlined_call_operand.vmem [shape: f32[8,512], index: 3, kind: input, shape index: {}]   ;;  %s3285_s6 = inlined_call_operand.vmem [shape: f32[4,17], index: 6, kind: input, shape index: {}]   ;;  %s3286_s1 = inlined_call_operand.vmem [shape: f32[16,8], index: 1, kind: input, shape index: {}]   ;;  %s3287_s7 = inlined_call_operand.vmem [shape: f32[16,5], index: 7, kind: input, shape index: {}]   ;;  %s3288_s8 = inlined_call_operand.vmem [shape: f32[16,512], index: 8, kind: output, shape index: {}]  }
   0x1   :  { %v2006_v0 = vld [vmem:[%s3280_s0 + $0x20] sm:$0xff]  ;;  %v2020_v2 = vld [vmem:[%s3280_s0 + $0x28] sm:$0xff]  ;;  %v2034_v4 = vld [vmem:[%s3280_s0 + $0x38] sm:$0xff]  ;;  %s1945_s23 = smov 7   ;;  %s1946_s24 = smov 1   ;;  %1916 = vset.pattern.permute.xlu0 %v1951_v32  ;;  %1917 = vset.pattern.permute.xlu1 %v1951_v32  ;;  %vm222_vm3 = vcmask 56320  }
   0x2   :  { %v2011_v1 = vld [vmem:[%s3280_s0] sm:$0xff]  ;;  %146 = vrot.lane.b32.xlu1 %v2006_v0, %s1943_s9  ;;  %v2025_v3 = vld [vmem:[%s3280_s0 + $0x8] sm:$0xff]  ;;  %v2039_v5 = vld [vmem:[%s3280_s0 + $0x18] sm:$0xff]  ;;  %s1947_s25 = smov 127   ;;  %s1948_s26 = smov 121   ;;  %vm257_vm4 = vcmask 7168  }
   0x3   :  { %140 = vrot.lane.b32.xlu0 %v2011_v1, %s1943_s9  ;;  %v2048_v6 = vld [vmem:[%s3280_s0 + $0x30] sm:$0xff]  ;;  %s1949_s27 = smov 120   ;;  %s1950_s28 = smov 119   ;;  %v38_v10 = vld [vmem:[%s3281_s2 + $0x8] sm:$0xff]  ;;  %v37_v19 = vld [vmem:[%s3281_s2] sm:$0xff]  ;;  %vm290_vm5 = vcmask 1039360  }
   0x4   :  { %v2053_v7 = vld [vmem:[%s3280_s0 + $0x10] sm:$0xff]  ;;  %v42_v11 = vld [vmem:[%s3281_s2 + $0x28] sm:$0xff]  ;;  %v41_v20 = vld [vmem:[%s3281_s2 + $0x20] sm:$0xff]  ;;  %vm325_vm6 = vcmask 990208   ;;  %vm360_vm7 = vcmask 982016   ;;  %vm395_vm8 = vcmask 973824  }
   0x5   :  { %v114_v14 = vld [vmem:[%s3282_s4 + $0x8] sm:$0xff]  ;;  %v2195_v28 = vld [vmem:[%s3281_s2 + $0x18] sm:$0xff]  ;;  %v2205_v30 = vld [vmem:[%s3281_s2 + $0x10] sm:$0xff]  ;;  %vm1954_vm9 = vmmov 0   ;;  %vm1429_vm10 = vcmask 31744   ;;  %vm1434_vm11 = vcmask 1043456  }
   0x6   :  { %148 = vrot.lane.b32.xlu1 %v2020_v2, %s1943_s9  ;;  %1713 = vmatprep.mubr.msk.f32.mxu0 %vm496_vm1, %v114_v14  ;;  %v2200_v29 = vld [vmem:[%s3281_s2 + $0x38] sm:$0xff]  ;;  %v2210_v31 = vld [vmem:[%s3281_s2 + $0x30] sm:$0xff]  ;;  %v2215_v36 = vld [vmem:[%s3283_s5] sm:$0xff] }
   0x7   :  { %142 = vrot.lane.b32.xlu0 %v2025_v3, %s1943_s9  ;;  %1715 = vmatprep.mubr.msk.f32.mxu1 %vm496_vm1, %v114_v14  ;;  %v2220_v37 = vld [vmem:[%s3283_s5 + $0x8] sm:$0xff]  ;;  %v2249_v58 = vld [vmem:[%s3281_s2 + $0x60] sm:$0xff]  ;;  %v2278_v14 = vld [vmem:[%s3281_s2 + $0x58] sm:$0xff] }
   0x8   :  { %v2235_v50 = vld [vmem:[%s3281_s2 + $0x48] sm:$0xff]  ;;  %v2254_v59 = vld [vmem:[%s3281_s2 + $0x40] sm:$0xff] }
   0x9   :  { %v2241_v52 = vld [vmem:[%s3281_s2 + $0x68] sm:$0xff] }
   0xa   :  { %130 = vrot.lane.b32.xlu1 %v2034_v4, %s1943_s9 }
   0xb   :  { %128 = vrot.lane.b32.xlu0 %v2039_v5, %s1943_s9 }
   0xe   :  { %150 = vrot.lane.b32.xlu1 %v2048_v6, %s1943_s9 }
   0xf   :  { %144 = vrot.lane.b32.xlu0 %v2053_v7, %s1943_s9 }
  0x12   :  { %177 = vrot.lane.b32.xlu1 %v2025_v3, %s1944_s22 }
  0x13   :  { %175 = vrot.lane.b32.xlu0 %v2011_v1, %s1944_s22 }
  0x16   :  { %183 = vrot.lane.b32.xlu1 %v2020_v2, %s1944_s22 }
  0x17   :  { %181 = vrot.lane.b32.xlu0 %v2006_v0, %s1944_s22 }
  0x1a   :  { %171 = vrot.lane.b32.xlu1 %v2034_v4, %s1944_s22 }
  0x1b   :  { %169 = vrot.lane.b32.xlu0 %v2039_v5, %s1944_s22 }
  0x1e   :  { %185 = vrot.lane.b32.xlu1 %v2048_v6, %s1944_s22 }
  0x1f   :  { %179 = vrot.lane.b32.xlu0 %v2053_v7, %s1944_s22 }
  0x22   :  { %212 = vrot.lane.b32.xlu1 %v2025_v3, %s1945_s23 }
  0x23   :  { %210 = vrot.lane.b32.xlu0 %v2011_v1, %s1945_s23 }
  0x26   :  { %218 = vrot.lane.b32.xlu1 %v2020_v2, %s1945_s23 }
  0x27   :  { %216 = vrot.lane.b32.xlu0 %v2006_v0, %s1945_s23 }
  0x2a   :  { %206 = vrot.lane.b32.xlu1 %v2034_v4, %s1945_s23 }
  0x2b   :  { %204 = vrot.lane.b32.xlu0 %v2039_v5, %s1945_s23 }
  0x2e   :  { %220 = vrot.lane.b32.xlu1 %v2048_v6, %s1945_s23 }
  0x2f   :  { %214 = vrot.lane.b32.xlu0 %v2053_v7, %s1945_s23 }
  0x32   :  { %247 = vrot.lane.b32.xlu1 %v2025_v3, %s1946_s24 }
  0x33   :  { %245 = vrot.lane.b32.xlu0 %v2011_v1, %s1946_s24 }
  0x36   :  { %253 = vrot.lane.b32.xlu1 %v2020_v2, %s1946_s24 }
  0x37   :  { %251 = vrot.lane.b32.xlu0 %v2006_v0, %s1946_s24 }
  0x3a   :  { %241 = vrot.lane.b32.xlu1 %v2034_v4, %s1946_s24 }
  0x3b   :  { %239 = vrot.lane.b32.xlu0 %v2039_v5, %s1946_s24 }
  0x3e   :  { %255 = vrot.lane.b32.xlu1 %v2048_v6, %s1946_s24 }
  0x3f   :  { %249 = vrot.lane.b32.xlu0 %v2053_v7, %s1946_s24 }
  0x42   :  { %278 = vrot.lane.b32.xlu1 %v2053_v7, %s1947_s25 }
  0x43   :  { %276 = vrot.lane.b32.xlu0 %v2025_v3, %s1947_s25 }
  0x46   :  { %286 = vrot.lane.b32.xlu1 %v2048_v6, %s1947_s25 }
  0x47   :  { %284 = vrot.lane.b32.xlu0 %v2020_v2, %s1947_s25 }
  0x4a   :  { %280 = vrot.lane.b32.xlu1 %v2039_v5, %s1947_s25 }
  0x4b   :  { %274 = vrot.lane.b32.xlu0 %v2011_v1, %s1947_s25 }
  0x4e   :  { %288 = vrot.lane.b32.xlu1 %v2034_v4, %s1947_s25 }
  0x4f   :  { %282 = vrot.lane.b32.xlu0 %v2006_v0, %s1947_s25 }
  0x52   :  { %313 = vrot.lane.b32.xlu1 %v2053_v7, %s1948_s26 }
  0x53   :  { %311 = vrot.lane.b32.xlu0 %v2025_v3, %s1948_s26 }
  0x56   :  { %321 = vrot.lane.b32.xlu1 %v2048_v6, %s1948_s26 }
  0x57   :  { %319 = vrot.lane.b32.xlu0 %v2020_v2, %s1948_s26 }
  0x5a   :  { %315 = vrot.lane.b32.xlu1 %v2039_v5, %s1948_s26 }
  0x5b   :  { %309 = vrot.lane.b32.xlu0 %v2011_v1, %s1948_s26 }
  0x5e   :  { %323 = vrot.lane.b32.xlu1 %v2034_v4, %s1948_s26 }
  0x5f   :  { %317 = vrot.lane.b32.xlu0 %v2006_v0, %s1948_s26 }
  0x62   :  { %348 = vrot.lane.b32.xlu1 %v2053_v7, %s1949_s27 }
  0x63   :  { %346 = vrot.lane.b32.xlu0 %v2025_v3, %s1949_s27 }
  0x66   :  { %356 = vrot.lane.b32.xlu1 %v2048_v6, %s1949_s27 }
  0x67   :  { %354 = vrot.lane.b32.xlu0 %v2020_v2, %s1949_s27 }
  0x6a   :  { %350 = vrot.lane.b32.xlu1 %v2039_v5, %s1949_s27 }
  0x6b   :  { %344 = vrot.lane.b32.xlu0 %v2011_v1, %s1949_s27 }
  0x6e   :  { %358 = vrot.lane.b32.xlu1 %v2034_v4, %s1949_s27 }
  0x6f   :  { %352 = vrot.lane.b32.xlu0 %v2006_v0, %s1949_s27 }
  0x72   :  { %383 = vrot.lane.b32.xlu1 %v2053_v7, %s1950_s28 }
  0x73   :  { %381 = vrot.lane.b32.xlu0 %v2025_v3, %s1950_s28 }
  0x74   :  { %v147_v8 = vpop.permute.xlu1 %146 }
  0x75   :  { %v141_v9 = vpop.permute.xlu0 %140 }
  0x76   :  { %391 = vrot.lane.b32.xlu1 %v2048_v6, %s1950_s28 }
  0x77   :  { %389 = vrot.lane.b32.xlu0 %v2020_v2, %s1950_s28 }
  0x78   :  { %v149_v12 = vpop.permute.xlu1 %148 }
  0x79   :  { %v143_v13 = vpop.permute.xlu0 %142  ;;  %v156_v16 = vsel %vm152_vm0, %v147_v8, %v149_v12 }
  0x7a   :  { %v153_v15 = vsel %vm152_vm0, %v141_v9, %v143_v13  ;;  %385 = vrot.lane.b32.xlu1 %v2039_v5, %s1950_s28  ;;  %v419_v18 = vmul.f32 %v156_v16, %v42_v11  ;;  %v2263_v11 = vld [vmem:[%s3281_s2 + $0x70] sm:$0xff] }
  0x7b   :  { %379 = vrot.lane.b32.xlu0 %v2011_v1, %s1950_s28  ;;  %v415_v17 = vmul.f32 %v153_v15, %v38_v10 }
  0x7c   :  { %v131_v21 = vpop.permute.xlu1 %130 }
  0x7d   :  { %v129_v22 = vpop.permute.xlu0 %128  ;;  %v1749_v23 = vpack.c.bf16 %v419_v18, %v415_v17  ;;  %v168_v24 = vsel %vm152_vm0, %v131_v21, %v147_v8 }
  0x7e   :  { %v167_v25 = vsel %vm152_vm0, %v129_v22, %v141_v9  ;;  %393 = vrot.lane.b32.xlu1 %v2034_v4, %s1950_s28  ;;  %v418_v27 = vmul.f32 %v168_v24, %v41_v20 }
  0x7f   :  { %387 = vrot.lane.b32.xlu0 %v2006_v0, %s1950_s28  ;;  %v414_v26 = vmul.f32 %v167_v25, %v37_v19  ;;  %1750 = vmatprep.subr.bf16.mxu0 %v1749_v23 }
  0x80   :  { %v151_v33 = vpop.permute.xlu1 %150 }
  0x81   :  { %v145_v34 = vpop.permute.xlu0 %144  ;;  %v1751_v35 = vpack.c.bf16 %v418_v27, %v414_v26  ;;  %v157_v38 = vsel %vm152_vm0, %v149_v12, %v151_v33  ;;  %v158_v41 = vsel %vm152_vm0, %v151_v33, %v131_v21  ;;  %v2268_v12 = vld [vmem:[%s3281_s2 + $0x78] sm:$0xff] }
  0x82   :  { %v154_v39 = vsel %vm152_vm0, %v143_v13, %v145_v34  ;;  %v155_v40 = vsel %vm152_vm0, %v145_v34, %v129_v22  ;;  %v421_v43 = vmul.f32 %v158_v41, %v2200_v29  ;;  %v420_v45 = vmul.f32 %v157_v38, %v2210_v31  ;;  %493 = vperm.xlu1 %1917, %v2220_v37   ;;  %v2273_v13 = vld [vmem:[%s3281_s2 + $0x50] sm:$0xff]  ;;  %v2291_v34 = vld [vmem:[%s3281_s2 + $0x88] sm:$0xff] }
  0x83   :  { %1752 = vmatpush1.bf16.msra.mxu0 %v1751_v35  ;;  %v417_v42 = vmul.f32 %v155_v40, %v2195_v28  ;;  %v416_v44 = vmul.f32 %v154_v39, %v2205_v30  ;;  %488 = vperm.xlu0 %1916, %v2215_v36   ;;  %v2297_v38 = vld [vmem:[%s3281_s2 + $0xa8] sm:$0xff] }
  0x84   :  { %v178_v46 = vpop.permute.xlu1 %177 }
  0x85   :  { %v176_v47 = vpop.permute.xlu0 %175  ;;  %v1785_v48 = vpack.c.bf16 %v421_v43, %v417_v42  ;;  %v1787_v49 = vpack.c.bf16 %v420_v45, %v416_v44  ;;  %v2305_v44 = vld [vmem:[%s3281_s2 + $0xa0] sm:$0xff] }
  0x86   :  { %v188_v51 = vsel %vm187_vm2, %v176_v47, %v178_v46  ;;  %v2310_v45 = vld [vmem:[%s3281_s2 + $0x80] sm:$0xff] }
  0x87   :  { %1786 = vmatprep.subr.bf16.mxu1 %v1785_v48  ;;  %v423_v56 = vmul.f32 %v188_v51, %v2235_v50 }
  0x88   :  { %1788 = vmatpush1.bf16.msra.mxu1 %v1787_v49  ;;  %v184_v53 = vpop.permute.xlu1 %183 }
  0x89   :  { %v182_v54 = vpop.permute.xlu0 %181 }
  0x8a   :  { %v191_v55 = vsel %vm187_vm2, %v182_v54, %v184_v53 }
  0x8b   :  { %v427_v57 = vmul.f32 %v191_v55, %v2241_v52  ;;  %v2319_v55 = vld [vmem:[%s3281_s2 + $0xb0] sm:$0xff] }
  0x8c   :  { %v172_v60 = vpop.permute.xlu1 %171 }
  0x8d   :  { %v170_v61 = vpop.permute.xlu0 %169  ;;  %v1753_v62 = vpack.c.bf16 %v427_v57, %v423_v56  ;;  %v203_v63 = vsel %vm187_vm2, %v172_v60, %v182_v54  ;;  %v2324_v56 = vld [vmem:[%s3281_s2 + $0xb8] sm:$0xff]  ;;  %v2329_v57 = vld [vmem:[%s3281_s2 + $0x90] sm:$0xff] }
  0x8e   :  { %v202_v8 = vsel %vm187_vm2, %v170_v61, %v176_v47  ;;  %v426_v9 = vmul.f32 %v203_v63, %v2249_v58 }
  0x8f   :  { %v422_v10 = vmul.f32 %v202_v8, %v2254_v59  ;;  %1754 = vmatprep.subr.bf16.mxu0 %v1753_v62 }
  0x90   :  { %v186_v15 = vpop.permute.xlu1 %185 }
  0x91   :  { %v180_v16 = vpop.permute.xlu0 %179  ;;  %v1755_v17 = vpack.c.bf16 %v426_v9, %v422_v10  ;;  %v192_v18 = vsel %vm187_vm2, %v184_v53, %v186_v15  ;;  %v193_v19 = vsel %vm187_vm2, %v186_v15, %v172_v60  ;;  %v2334_v60 = vld [vmem:[%s3281_s2 + $0x98] sm:$0xff] }
  0x92   :  { %v189_v20 = vsel %vm187_vm2, %v178_v46, %v180_v16  ;;  %v190_v21 = vsel %vm187_vm2, %v180_v16, %v170_v61  ;;  %v428_v22 = vmul.f32 %v192_v18, %v2263_v11  ;;  %v429_v23 = vmul.f32 %v193_v19, %v2268_v12 }
  0x93   :  { %v424_v24 = vmul.f32 %v189_v20, %v2273_v13  ;;  %v425_v25 = vmul.f32 %v190_v21, %v2278_v14  ;;  %1756 = vmatpush1.bf16.msra.mxu0 %v1755_v17 }
  0x94   :  { %v213_v26 = vpop.permute.xlu1 %212 }
  0x95   :  { %v211_v27 = vpop.permute.xlu0 %210  ;;  %v1789_v32 = vpack.c.bf16 %v429_v23, %v425_v25  ;;  %v1791_v33 = vpack.c.bf16 %v428_v22, %v424_v24  ;;  %v2347_v24 = vld [vmem:[%s3281_s2 + $0xc8] sm:$0xff] }
  0x96   :  { %v223_v35 = vsel %vm222_vm3, %v211_v27, %v213_v26 }
  0x97   :  { %1790 = vmatprep.subr.bf16.mxu1 %v1789_v32  ;;  %v431_v42 = vmul.f32 %v223_v35, %v2291_v34  ;;  %v2363_v35 = vld [vmem:[%s3281_s2 + $0x128] sm:$0xff] }
  0x98   :  { %1792 = vmatpush1.bf16.msra.mxu1 %v1791_v33  ;;  %v219_v39 = vpop.permute.xlu1 %218  ;;  %v2358_v33 = vld [vmem:[%s3281_s2 + $0x108] sm:$0xff] }
  0x99   :  { %v217_v40 = vpop.permute.xlu0 %216  ;;  %3356 = vst [vmem:[#allocation3_spill] sm:$0xff] %v2358_v33 }
  0x9a   :  { %v226_v41 = vsel %vm222_vm3, %v217_v40, %v219_v39 }
  0x9b   :  { %v435_v43 = vmul.f32 %v226_v41, %v2297_v38  ;;  %v2374_v41 = vld [vmem:[%s3281_s2 + $0x120] sm:$0xff] }
  0x9c   :  { %v207_v46 = vpop.permute.xlu1 %206  ;;  %3358 = vst [vmem:[#allocation5_spill] sm:$0xff] %v2374_v41 }
  0x9d   :  { %v205_v47 = vpop.permute.xlu0 %204  ;;  %v1757_v48 = vpack.c.bf16 %v435_v43, %v431_v42  ;;  %v238_v49 = vsel %vm222_vm3, %v207_v46, %v217_v40  ;;  %v2369_v40 = vld [vmem:[%s3281_s2 + $0x100] sm:$0xff] }
  0x9e   :  { %v237_v51 = vsel %vm222_vm3, %v205_v47, %v211_v27  ;;  %v434_v53 = vmul.f32 %v238_v49, %v2305_v44  ;;  %3357 = vst [vmem:[#allocation4_spill] sm:$0xff] %v2369_v40  ;;  %v451_v49 = vmul.f32 %v2363_v35, %v2020_v2  ;;  %v2406_v2 = vld [vmem:[%s3281_s2 + $0x138] sm:$0xff] }
  0x9f   :  { %v430_v54 = vmul.f32 %v237_v51, %v2310_v45  ;;  %1758 = vmatprep.subr.bf16.mxu0 %v1757_v48  ;;  %v447_v48 = vmul.f32 %v2358_v33, %v2025_v3  ;;  %v2401_v3 = vld [vmem:[%s3281_s2 + $0x118] sm:$0xff] }
  0xa0   :  { %v221_v61 = vpop.permute.xlu1 %220  ;;  %3361 = vst [vmem:[#allocation8_spill] sm:$0xff] %v2401_v3 }
  0xa1   :  { %v215_v62 = vpop.permute.xlu0 %214  ;;  %v1759_v63 = vpack.c.bf16 %v434_v53, %v430_v54  ;;  %v227_v8 = vsel %vm222_vm3, %v219_v39, %v221_v61  ;;  %v228_v9 = vsel %vm222_vm3, %v221_v61, %v207_v46  ;;  %v2381_v46 = vld [vmem:[%s3281_s2 + $0xe0] sm:$0xff]  ;;  %v446_v61 = vmul.f32 %v2369_v40, %v2011_v1 }
  0xa2   :  { %v224_v10 = vsel %vm222_vm3, %v213_v26, %v215_v62  ;;  %v225_v15 = vsel %vm222_vm3, %v215_v62, %v205_v47  ;;  %v436_v16 = vmul.f32 %v227_v8, %v2319_v55  ;;  %v437_v17 = vmul.f32 %v228_v9, %v2324_v56  ;;  %v2353_v26 = vld [vmem:[%s3281_s2 + $0xe8] sm:$0xff]  ;;  %3359 = vst [vmem:[#allocation6_spill] sm:$0xff] %v2381_v46  ;;  %v2386_v47 = vld [vmem:[%s3281_s2 + $0xc0] sm:$0xff] }
  0xa3   :  { %v432_v18 = vmul.f32 %v224_v10, %v2329_v57  ;;  %v433_v19 = vmul.f32 %v225_v15, %v2334_v60  ;;  %1760 = vmatpush1.bf16.msra.mxu0 %v1759_v63  ;;  %3355 = vst [vmem:[#allocation2_spill] sm:$0xff] %v2353_v26  ;;  %3360 = vst [vmem:[#allocation7_spill] sm:$0xff] %v2386_v47  ;;  %v450_v62 = vmul.f32 %v2374_v41, %v2006_v0  ;;  %v2413_v0 = vld [vmem:[%s3281_s2 + $0xf0] sm:$0xff]  ;;  %v2418_v10 = vld [vmem:[%s3281_s2 + $0xf8] sm:$0xff] }
  0xa4   :  { %v248_v20 = vpop.permute.xlu1 %247  ;;  %3362 = vst [vmem:[#allocation9_spill] sm:$0xff] %v2418_v10  ;;  %v2423_v15 = vld [vmem:[%s3281_s2 + $0xd0] sm:$0xff] }
  0xa5   :  { %v246_v21 = vpop.permute.xlu0 %245  ;;  %v1793_v22 = vpack.c.bf16 %v437_v17, %v433_v19  ;;  %v1795_v23 = vpack.c.bf16 %v436_v16, %v432_v18  ;;  %3363 = vst [vmem:[#allocation10_spill] sm:$0xff] %v2423_v15  ;;  %v2428_v16 = vld [vmem:[%s3281_s2 + $0xd8] sm:$0xff]  ;;  %v1765_v17 = vpack.c.bf16 %v451_v49, %v447_v48 }
  0xa6   :  { %v258_v25 = vsel %vm257_vm4, %v246_v21, %v248_v20  ;;  %3364 = vst [vmem:[#allocation11_spill] sm:$0xff] %v2428_v16 }
  0xa7   :  { %1794 = vmatprep.subr.bf16.mxu1 %v1793_v22  ;;  %v439_v42 = vmul.f32 %v258_v25, %v2347_v24  ;;  %v1767_v22 = vpack.c.bf16 %v450_v62, %v446_v61  ;;  %v453_v25 = vmul.f32 %v2406_v2, %v2034_v4 }
  0xa8   :  { %1796 = vmatpush1.bf16.msra.mxu1 %v1795_v23  ;;  %v254_v27 = vpop.permute.xlu1 %253  ;;  %v449_v23 = vmul.f32 %v2401_v3, %v2039_v5 }
  0xa9   :  { %v252_v32 = vpop.permute.xlu0 %251 }
  0xaa   :  { %v261_v39 = vsel %vm257_vm4, %v252_v32, %v254_v27 }
  0xab   :  { %v443_v43 = vmul.f32 %v261_v39, %v2353_v26  ;;  %v2442_v39 = vld [vmem:[%s3281_s2 + $0x130] sm:$0xff] }
  0xac   :  { %v242_v51 = vpop.permute.xlu1 %241  ;;  %3366 = vst [vmem:[#allocation13_spill] sm:$0xff] %v2442_v39 }
  0xad   :  { %v240_v53 = vpop.permute.xlu0 %239  ;;  %v1761_v54 = vpack.c.bf16 %v443_v43, %v439_v42  ;;  %v273_v63 = vsel %vm257_vm4, %v242_v51, %v252_v32  ;;  %v2437_v32 = vld [vmem:[%s3281_s2 + $0x110] sm:$0xff] }
  0xae   :  { %v272_v8 = vsel %vm257_vm4, %v240_v53, %v246_v21  ;;  %v442_v9 = vmul.f32 %v273_v63, %v2381_v46  ;;  %3365 = vst [vmem:[#allocation12_spill] sm:$0xff] %v2437_v32  ;;  %v448_v62 = vmul.f32 %v2437_v32, %v2053_v7 }
  0xaf   :  { %v438_v1 = vmul.f32 %v272_v8, %v2386_v47  ;;  %1762 = vmatprep.subr.bf16.mxu0 %v1761_v54  ;;  %v1801_v8 = vpack.c.bf16 %v453_v25, %v449_v23 }
  0xb0   :  { %v256_v18 = vpop.permute.xlu1 %255 }
  0xb1   :  { %v250_v19 = vpop.permute.xlu0 %249  ;;  %v1763_v21 = vpack.c.bf16 %v442_v9, %v438_v1  ;;  %v262_v42 = vsel %vm257_vm4, %v254_v27, %v256_v18  ;;  %v263_v43 = vsel %vm257_vm4, %v256_v18, %v242_v51  ;;  %v452_v27 = vmul.f32 %v2442_v39, %v2048_v6  ;;  %v2459_v9 = vld [vmem:[%s3281_s2 + $0x148] sm:$0xff] }
  0xb2   :  { %v259_v48 = vsel %vm257_vm4, %v248_v20, %v250_v19  ;;  %v260_v5 = vsel %vm257_vm4, %v250_v19, %v240_v53  ;;  %v444_v4 = vmul.f32 %v262_v42, %v2413_v0  ;;  %v445_v49 = vmul.f32 %v263_v43, %v2418_v10  ;;  %3367 = vst [vmem:[#allocation14_spill] sm:$0xff] %v2459_v9  ;;  %v2465_v6 = vld [vmem:[%s3281_s2 + $0x168] sm:$0xff]  ;;  %v2473_v43 = vld [vmem:[%s3281_s2 + $0x150] sm:$0xff] }
  0xb3   :  { %v440_v54 = vmul.f32 %v259_v48, %v2423_v15  ;;  %v441_v61 = vmul.f32 %v260_v5, %v2428_v16  ;;  %1764 = vmatpush1.bf16.msra.mxu0 %v1763_v21  ;;  %3368 = vst [vmem:[#allocation15_spill] sm:$0xff] %v2465_v6  ;;  %v1803_v7 = vpack.c.bf16 %v452_v27, %v448_v62  ;;  %3369 = vst [vmem:[#allocation16_spill] sm:$0xff] %v2473_v43  ;;  %v2479_v5 = vld [vmem:[%s3281_s2 + $0x140] sm:$0xff]  ;;  %v2501_v27 = vld [vmem:[%s3281_s2 + $0x178] sm:$0xff] }
  0xb4   :  { %1766 = vmatprep.subr.bf16.mxu0 %v1765_v17  ;;  %v279_v51 = vpop.permute.xlu1 %278  ;;  %3370 = vst [vmem:[#allocation17_spill] sm:$0xff] %v2479_v5  ;;  %v2496_v62 = vld [vmem:[%s3281_s2 + $0x160] sm:$0xff]  ;;  %3374 = vst [vmem:[#allocation21_spill] sm:$0xff] %v2501_v27 }
  0xb5   :  { %v277_v20 = vpop.permute.xlu0 %276  ;;  %v1797_v53 = vpack.c.bf16 %v445_v49, %v441_v61  ;;  %v1799_v63 = vpack.c.bf16 %v444_v4, %v440_v54  ;;  %v2484_v4 = vld [vmem:[%s3281_s2 + $0x158] sm:$0xff]  ;;  %v2491_v61 = vld [vmem:[%s3281_s2 + $0x170] sm:$0xff]  ;;  %3373 = vst [vmem:[#allocation20_spill] sm:$0xff] %v2496_v62 }
  0xb6   :  { %v292_v1 = vsel %vm290_vm5, %v277_v20, %v279_v51  ;;  %3371 = vst [vmem:[#allocation18_spill] sm:$0xff] %v2484_v4  ;;  %3372 = vst [vmem:[#allocation19_spill] sm:$0xff] %v2491_v61 }
  0xb7   :  { %1798 = vmatprep.subr.bf16.mxu1 %v1797_v53  ;;  %1768 = vmatpush1.bf16.msra.mxu0 %v1767_v22  ;;  %v455_v21 = vmul.f32 %v292_v1, %v2459_v9 }
  0xb8   :  { %1800 = vmatpush1.bf16.msra.mxu1 %v1799_v63  ;;  %v287_v17 = vpop.permute.xlu1 %286 }
  0xb9   :  { %v285_v18 = vpop.permute.xlu0 %284  ;;  %1802 = vmatprep.subr.bf16.mxu1 %v1801_v8 }
  0xba   :  { %v295_v19 = vsel %vm290_vm5, %v285_v18, %v287_v17 }
  0xbb   :  { %v459_v22 = vmul.f32 %v295_v19, %v2465_v6 }
  0xbc   :  { %1804 = vmatpush1.bf16.msra.mxu1 %v1803_v7  ;;  %v281_v23 = vpop.permute.xlu1 %280 }
  0xbd   :  { %v275_v25 = vpop.permute.xlu0 %274  ;;  %v1769_v42 = vpack.c.bf16 %v459_v22, %v455_v21  ;;  %v293_v48 = vsel %vm290_vm5, %v279_v51, %v281_v23 }
  0xbe   :  { %v291_v49 = vsel %vm290_vm5, %v275_v25, %v277_v20  ;;  %v307_v54 = vsel %vm290_vm5, %v281_v23, %v275_v25  ;;  %v456_v51 = vmul.f32 %v293_v48, %v2473_v43 }
  0xbf   :  { %1770 = vmatprep.subr.bf16.mxu0 %v1769_v42  ;;  %v454_v63 = vmul.f32 %v291_v49, %v2479_v5  ;;  %v457_v19 = vmul.f32 %v307_v54, %v2484_v4  ;;  %v2521_v54 = vld [vmem:[%s3281_s2 + $0x1a8] sm:$0xff] }
  0xc0   :  { %v289_v20 = vpop.permute.xlu1 %288  ;;  %3376 = vst [vmem:[#allocation23_spill] sm:$0xff] %v2521_v54 }
  0xc1   :  { %v283_v53 = vpop.permute.xlu0 %282  ;;  %v296_v8 = vsel %vm290_vm5, %v287_v17, %v289_v20  ;;  %v2515_v17 = vld [vmem:[%s3281_s2 + $0x188] sm:$0xff] }
  0xc2   :  { %v294_v1 = vsel %vm290_vm5, %v283_v53, %v285_v18  ;;  %v308_v7 = vsel %vm290_vm5, %v289_v20, %v283_v53  ;;  %v460_v21 = vmul.f32 %v296_v8, %v2491_v61  ;;  %3375 = vst [vmem:[#allocation22_spill] sm:$0xff] %v2515_v17 }
  0xc3   :  { %v458_v22 = vmul.f32 %v294_v1, %v2496_v62  ;;  %v461_v23 = vmul.f32 %v308_v7, %v2501_v27 }
  0xc4   :  { %v314_v25 = vpop.permute.xlu1 %313  ;;  %v1807_v49 = vpack.c.bf16 %v460_v21, %v456_v51 }
  0xc5   :  { %v312_v42 = vpop.permute.xlu0 %311  ;;  %v1771_v48 = vpack.c.bf16 %v458_v22, %v454_v63  ;;  %v1805_v43 = vpack.c.bf16 %v461_v23, %v457_v19  ;;  %v2529_v19 = vld [vmem:[%s3281_s2 + $0x190] sm:$0xff]  ;;  %v2535_v22 = vld [vmem:[%s3281_s2 + $0x180] sm:$0xff]  ;;  %v2540_v23 = vld [vmem:[%s3281_s2 + $0x198] sm:$0xff] }
  0xc6   :  { %v327_v18 = vsel %vm325_vm6, %v312_v42, %v314_v25  ;;  %3377 = vst [vmem:[#allocation24_spill] sm:$0xff] %v2529_v19  ;;  %3378 = vst [vmem:[#allocation25_spill] sm:$0xff] %v2535_v22 }
  0xc7   :  { %1772 = vmatpush1.bf16.msra.mxu0 %v1771_v48  ;;  %1806 = vmatprep.subr.bf16.mxu1 %v1805_v43  ;;  %v463_v51 = vmul.f32 %v327_v18, %v2515_v17  ;;  %3379 = vst [vmem:[#allocation26_spill] sm:$0xff] %v2540_v23  ;;  %v2547_v18 = vld [vmem:[%s3281_s2 + $0x1b0] sm:$0xff] }
  0xc8   :  { %1808 = vmatpush1.bf16.msra.mxu1 %v1807_v49  ;;  %v322_v20 = vpop.permute.xlu1 %321  ;;  %3380 = vst [vmem:[#allocation27_spill] sm:$0xff] %v2547_v18 }
  0xc9   :  { %v320_v53 = vpop.permute.xlu0 %319 }
  0xca   :  { %v330_v63 = vsel %vm325_vm6, %v320_v53, %v322_v20 }
  0xcb   :  { %v467_v43 = vmul.f32 %v330_v63, %v2521_v54  ;;  %v2557_v63 = vld [vmem:[%s3281_s2 + $0x1b8] sm:$0xff] }
  0xcc   :  { %v316_v8 = vpop.permute.xlu1 %315  ;;  %3382 = vst [vmem:[#allocation29_spill] sm:$0xff] %v2557_v63 }
  0xcd   :  { %v310_v1 = vpop.permute.xlu0 %309  ;;  %v1773_v7 = vpack.c.bf16 %v467_v43, %v463_v51  ;;  %v328_v21 = vsel %vm325_vm6, %v314_v25, %v316_v8  ;;  %v2552_v25 = vld [vmem:[%s3281_s2 + $0x1a0] sm:$0xff] }
  0xce   :  { %v326_v48 = vsel %vm325_vm6, %v310_v1, %v312_v42  ;;  %v342_v49 = vsel %vm325_vm6, %v316_v8, %v310_v1  ;;  %3381 = vst [vmem:[#allocation28_spill] sm:$0xff] %v2552_v25  ;;  %v464_v42 = vmul.f32 %v328_v21, %v2529_v19 }
  0xcf   :  { %1774 = vmatprep.subr.bf16.mxu0 %v1773_v7  ;;  %v462_v8 = vmul.f32 %v326_v48, %v2535_v22  ;;  %v465_v61 = vmul.f32 %v342_v49, %v2540_v23 }
  0xd0   :  { %v324_v51 = vpop.permute.xlu1 %323 }
  0xd1   :  { %v318_v43 = vpop.permute.xlu0 %317  ;;  %v331_v1 = vsel %vm325_vm6, %v322_v20, %v324_v51  ;;  %v2571_v20 = vld [vmem:[%s3281_s2 + $0x1c8] sm:$0xff] }
  0xd2   :  { %v329_v7 = vsel %vm325_vm6, %v318_v43, %v320_v53  ;;  %v343_v27 = vsel %vm325_vm6, %v324_v51, %v318_v43  ;;  %v468_v4 = vmul.f32 %v331_v1, %v2547_v18  ;;  %3383 = vst [vmem:[#allocation30_spill] sm:$0xff] %v2571_v20  ;;  %v2596_v1 = vld [vmem:[%s3281_s2 + $0x1d8] sm:$0xff] }
  0xd3   :  { %v466_v54 = vmul.f32 %v329_v7, %v2552_v25  ;;  %v469_v17 = vmul.f32 %v343_v27, %v2557_v63  ;;  %v2577_v27 = vld [vmem:[%s3281_s2 + $0x1e8] sm:$0xff]  ;;  %3387 = vst [vmem:[#allocation34_spill] sm:$0xff] %v2596_v1 }
  0xd4   :  { %v349_v6 = vpop.permute.xlu1 %348  ;;  %v1811_v48 = vpack.c.bf16 %v468_v4, %v464_v42  ;;  %3384 = vst [vmem:[#allocation31_spill] sm:$0xff] %v2577_v27  ;;  %v2585_v42 = vld [vmem:[%s3281_s2 + $0x1d0] sm:$0xff] }
  0xd5   :  { %v347_v21 = vpop.permute.xlu0 %346  ;;  %v1775_v19 = vpack.c.bf16 %v466_v54, %v462_v8  ;;  %v1809_v62 = vpack.c.bf16 %v469_v17, %v465_v61  ;;  %3385 = vst [vmem:[#allocation32_spill] sm:$0xff] %v2585_v42  ;;  %v2591_v8 = vld [vmem:[%s3281_s2 + $0x1c0] sm:$0xff] }
  0xd6   :  { %v362_v53 = vsel %vm360_vm7, %v347_v21, %v349_v6  ;;  %3386 = vst [vmem:[#allocation33_spill] sm:$0xff] %v2591_v8 }
  0xd7   :  { %1776 = vmatpush1.bf16.msra.mxu0 %v1775_v19  ;;  %1810 = vmatprep.subr.bf16.mxu1 %v1809_v62  ;;  %v471_v4 = vmul.f32 %v362_v53, %v2571_v20  ;;  %v2603_v53 = vld [vmem:[%s3281_s2 + $0x1f0] sm:$0xff] }
  0xd8   :  { %1812 = vmatpush1.bf16.msra.mxu1 %v1811_v48  ;;  %v357_v49 = vpop.permute.xlu1 %356  ;;  %3388 = vst [vmem:[#allocation35_spill] sm:$0xff] %v2603_v53 }
  0xd9   :  { %v355_v51 = vpop.permute.xlu0 %354 }
  0xda   :  { %v365_v61 = vsel %vm360_vm7, %v355_v51, %v357_v49 }
  0xdb   :  { %v475_v62 = vmul.f32 %v365_v61, %v2577_v27  ;;  %v2613_v61 = vld [vmem:[%s3281_s2 + $0x1f8] sm:$0xff] }
  0xdc   :  { %v351_v17 = vpop.permute.xlu1 %350  ;;  %3390 = vst [vmem:[#allocation37_spill] sm:$0xff] %v2613_v61 }
  0xdd   :  { %v345_v54 = vpop.permute.xlu0 %344  ;;  %v1777_v19 = vpack.c.bf16 %v475_v62, %v471_v4  ;;  %v363_v43 = vsel %vm360_vm7, %v349_v6, %v351_v17  ;;  %v2608_v6 = vld [vmem:[%s3281_s2 + $0x1e0] sm:$0xff] }
  0xde   :  { %v361_v7 = vsel %vm360_vm7, %v345_v54, %v347_v21  ;;  %v377_v48 = vsel %vm360_vm7, %v351_v17, %v345_v54  ;;  %3389 = vst [vmem:[#allocation36_spill] sm:$0xff] %v2608_v6  ;;  %v472_v21 = vmul.f32 %v363_v43, %v2585_v42 }
  0xdf   :  { %1778 = vmatprep.subr.bf16.mxu0 %v1777_v19  ;;  %v470_v17 = vmul.f32 %v361_v7, %v2591_v8  ;;  %v473_v18 = vmul.f32 %v377_v48, %v2596_v1 }
  0xe0   :  { %v359_v4 = vpop.permute.xlu1 %358 }
  0xe1   :  { %v353_v62 = vpop.permute.xlu0 %352  ;;  %v366_v54 = vsel %vm360_vm7, %v357_v49, %v359_v4  ;;  %v2627_v49 = vld [vmem:[%s3281_s2 + $0x208] sm:$0xff] }
  0xe2   :  { %v364_v19 = vsel %vm360_vm7, %v353_v62, %v355_v51  ;;  %v378_v63 = vsel %vm360_vm7, %v359_v4, %v353_v62  ;;  %v476_v23 = vmul.f32 %v366_v54, %v2603_v53  ;;  %3391 = vst [vmem:[#allocation38_spill] sm:$0xff] %v2627_v49  ;;  %v2652_v54 = vld [vmem:[%s3281_s2 + $0x218] sm:$0xff] }
  0xe3   :  { %v474_v27 = vmul.f32 %v364_v19, %v2608_v6  ;;  %v477_v20 = vmul.f32 %v378_v63, %v2613_v61  ;;  %v2633_v63 = vld [vmem:[%s3281_s2 + $0x228] sm:$0xff]  ;;  %3395 = vst [vmem:[#allocation42_spill] sm:$0xff] %v2652_v54 }
  0xe4   :  { %v384_v25 = vpop.permute.xlu1 %383  ;;  %v1815_v7 = vpack.c.bf16 %v476_v23, %v472_v21  ;;  %3392 = vst [vmem:[#allocation39_spill] sm:$0xff] %v2633_v63  ;;  %v2641_v21 = vld [vmem:[%s3281_s2 + $0x210] sm:$0xff] }
  0xe5   :  { %v382_v43 = vpop.permute.xlu0 %381  ;;  %v1779_v42 = vpack.c.bf16 %v474_v27, %v470_v17  ;;  %v1813_v22 = vpack.c.bf16 %v477_v20, %v473_v18  ;;  %3393 = vst [vmem:[#allocation40_spill] sm:$0xff] %v2641_v21  ;;  %v2647_v17 = vld [vmem:[%s3281_s2 + $0x200] sm:$0xff] }
  0xe6   :  { %v397_v51 = vsel %vm395_vm8, %v382_v43, %v384_v25  ;;  %3394 = vst [vmem:[#allocation41_spill] sm:$0xff] %v2647_v17 }
  0xe7   :  { %1780 = vmatpush1.bf16.msra.mxu0 %v1779_v42  ;;  %1814 = vmatprep.subr.bf16.mxu1 %v1813_v22  ;;  %v479_v23 = vmul.f32 %v397_v51, %v2627_v49  ;;  %v2659_v51 = vld [vmem:[%s3281_s2 + $0x230] sm:$0xff] }
  0xe8   :  { %1816 = vmatpush1.bf16.msra.mxu1 %v1815_v7  ;;  %v392_v48 = vpop.permute.xlu1 %391  ;;  %3396 = vst [vmem:[#allocation43_spill] sm:$0xff] %v2659_v51 }
  0xe9   :  { %v390_v4 = vpop.permute.xlu0 %389 }
  0xea   :  { %v400_v18 = vsel %vm395_vm8, %v390_v4, %v392_v48 }
  0xeb   :  { %v483_v22 = vmul.f32 %v400_v18, %v2633_v63  ;;  %v2669_v18 = vld [vmem:[%s3281_s2 + $0x238] sm:$0xff] }
  0xec   :  { %v386_v20 = vpop.permute.xlu1 %385  ;;  %3398 = vst [vmem:[#allocation45_spill] sm:$0xff] %v2669_v18 }
  0xed   :  { %v380_v27 = vpop.permute.xlu0 %379  ;;  %v1781_v42 = vpack.c.bf16 %v483_v22, %v479_v23  ;;  %v398_v62 = vsel %vm395_vm8, %v384_v25, %v386_v20  ;;  %v2664_v25 = vld [vmem:[%s3281_s2 + $0x220] sm:$0xff] }
  0xee   :  { %v396_v19 = vsel %vm395_vm8, %v380_v27, %v382_v43  ;;  %v412_v7 = vsel %vm395_vm8, %v386_v20, %v380_v27  ;;  %3397 = vst [vmem:[#allocation44_spill] sm:$0xff] %v2664_v25  ;;  %v480_v43 = vmul.f32 %v398_v62, %v2641_v21 }
  0xef   :  { %1782 = vmatprep.subr.bf16.mxu0 %v1781_v42  ;;  %v478_v20 = vmul.f32 %v396_v19, %v2647_v17  ;;  %v481_v53 = vmul.f32 %v412_v7, %v2652_v54 }
  0xf0   :  { %v394_v23 = vpop.permute.xlu1 %393 }
  0xf1   :  { %v388_v22 = vpop.permute.xlu0 %387  ;;  %v401_v27 = vsel %vm395_vm8, %v392_v48, %v394_v23  ;;  %v113_v48 = vld [vmem:[%s3282_s4] sm:$0xff] }
  0xf2   :  { %v399_v42 = vsel %vm395_vm8, %v388_v22, %v390_v4  ;;  %v413_v61 = vsel %vm395_vm8, %v394_v23, %v388_v22  ;;  %v484_v1 = vmul.f32 %v401_v27, %v2659_v51  ;;  %v116_v4 = vld [vmem:[%s3282_s4 + $0x18] sm:$0xff] }
  0xf3   :  { %v482_v63 = vmul.f32 %v399_v42, %v2664_v25  ;;  %v485_v49 = vmul.f32 %v413_v61, %v2669_v18 }
  0xf4   :  { %v1819_v21 = vpack.c.bf16 %v484_v1, %v480_v43 }
  0xf5   :  { %v1783_v6 = vpack.c.bf16 %v482_v63, %v478_v20  ;;  %v1817_v62 = vpack.c.bf16 %v485_v49, %v481_v53  ;;  %v115_v53 = vld [vmem:[%s3282_s4 + $0x10] sm:$0xff] }
  0xf7   :  { %1784 = vmatpush1.bf16.msra.mxu0 %v1783_v6  ;;  %1818 = vmatprep.subr.bf16.mxu1 %v1817_v62 }
  0xf8   :  { %1820 = vmatpush1.bf16.msra.mxu1 %v1819_v21 }
  0xfa   :  { %568 = vmatmul.mubr.f32.vlgmr.msra.gmra.mrb[0].mxu0 %v113_v48 }
  0xfb   :  { %645 = vmatmul.mubr.f32.vlgmr.msra.gmra.mrb[0].mxu1 %v113_v48  ;;  %1714 = vmatprep.mubr.msk.f32.mxu0 %vm496_vm1, %v116_v4 }
  0xfc   :  { %1716 = vmatprep.mubr.msk.f32.mxu1 %vm496_vm1, %v116_v4 }
  0xfe   :  { %574 = vmatmul.mubr.f32.gmra.mrb[2].mxu0 %v115_v53 }
  0xff   :  { %651 = vmatmul.mubr.f32.gmra.mrb[2].mxu1 %v115_v53 }
 0x101   :  { %v494_v48 = vpop.permute.xlu1 %493 }
 0x102   :  { %v489_v1 = vpop.permute.xlu0 %488 }
 0x1cd   :  { %v569_v6 = vpop.f32.mrb[0].mxu0 }
 0x1ce   :  { %v570_v61 = vadd.f32 %v569_v6, %v489_v1  ;;  %v571_v49 = vpop.f32.mrb[1].mxu0  ;;  %v646_v63 = vpop.f32.mrb[0].mxu1 }
 0x1cf   :  { %v647_v21 = vadd.f32 %v646_v63, %v489_v1  ;;  %v648_v19 = vpop.f32.mrb[1].mxu1  ;;  %v572_v42 = vadd.f32 %v571_v49, %v489_v1 }
 0x1d0   :  { %v2691_v7 = vmax.f32 %v570_v61, 0.0  ;;  %v649_v6 = vadd.f32 %v648_v19, %v489_v1 }
 0x1d1   :  { %v2693_v43 = vmax.f32 %v647_v21, 0.0  ;;  %v575_v23 = vpop.f32.mrb[2].mxu0  ;;  %v2707_v62 = vmax.f32 %v572_v42, 0.0 }
 0x1d2   :  { %3399 = vst [vmem:[#allocation46_spill] sm:$0xff] %v2691_v7  ;;  %v577_v22 = vpop.f32.mrb[3].mxu0  ;;  %v652_v20 = vpop.f32.mrb[2].mxu1  ;;  %679 = vrot.lane.b32.xlu1 %v2691_v7, %s1943_s9  ;;  %v2743_v61 = vmax.f32 %v649_v6, 0.0  ;;  %v576_v49 = vadd.f32 %v575_v23, %v494_v48 }
 0x1d3   :  { %3400 = vst [vmem:[#allocation47_spill] sm:$0xff] %v2693_v43  ;;  %v654_v27 = vpop.f32.mrb[3].mxu1  ;;  %813 = vrot.lane.b32.xlu0 %v2693_v43, %s1947_s25  ;;  %3401 = vst [vmem:[#allocation48_spill] sm:$0xff] %v2707_v62  ;;  %v653_v4 = vadd.f32 %v652_v20, %v494_v48  ;;  %v578_v1 = vadd.f32 %v577_v22, %v494_v48  ;;  %v118_v22 = vld [vmem:[%s3282_s4 + $0x28] sm:$0xff] }
 0x1d4   :  { %3403 = vst [vmem:[#allocation50_spill] sm:$0xff] %v2743_v61  ;;  %v2749_v63 = vmax.f32 %v576_v49, 0.0  ;;  %v655_v19 = vadd.f32 %v654_v27, %v494_v48  ;;  %1717 = vmatprep.mubr.msk.f32.mxu0 %vm496_vm1, %v118_v22  ;;  %1719 = vmatprep.mubr.msk.f32.mxu1 %vm496_vm1, %v118_v22 }
 0x1d5   :  { %v2725_v53 = vmax.f32 %v653_v4, 0.0  ;;  %v2771_v21 = vmax.f32 %v578_v1, 0.0  ;;  %v1952_v1 = vmov 1  }
 0x1d6   :  { %713 = vrot.lane.b32.xlu1 %v2691_v7, %s1944_s22  ;;  %3404 = vst [vmem:[#allocation51_spill] sm:$0xff] %v2749_v63  ;;  %v2777_v23 = vmax.f32 %v655_v19, 0.0  ;;  %1919 = vset.pattern.permute.xlu0 %v1952_v1 }
 0x1d7   :  { %847 = vrot.lane.b32.xlu0 %v2693_v43, %s1948_s26  ;;  %3402 = vst [vmem:[#allocation49_spill] sm:$0xff] %v2725_v53  ;;  %1918 = vset.pattern.permute.xlu1 %v1952_v1 }
 0x1da   :  { %683 = vrot.lane.b32.xlu1 %v2693_v43, %s1943_s9 }
 0x1db   :  { %881 = vrot.lane.b32.xlu0 %v2693_v43, %s1949_s27 }
 0x1de   :  { %747 = vrot.lane.b32.xlu1 %v2691_v7, %s1945_s23 }
 0x1df   :  { %681 = vrot.lane.b32.xlu0 %v2707_v62, %s1943_s9 }
 0x1e2   :  { %717 = vrot.lane.b32.xlu1 %v2693_v43, %s1944_s22 }
 0x1e3   :  { %715 = vrot.lane.b32.xlu0 %v2707_v62, %s1944_s22 }
 0x1e6   :  { %781 = vrot.lane.b32.xlu1 %v2691_v7, %s1946_s24 }
 0x1e7   :  { %749 = vrot.lane.b32.xlu0 %v2707_v62, %s1945_s23 }
 0x1ea   :  { %751 = vrot.lane.b32.xlu1 %v2693_v43, %s1945_s23 }
 0x1eb   :  { %783 = vrot.lane.b32.xlu0 %v2707_v62, %s1946_s24 }
 0x1ee   :  { %785 = vrot.lane.b32.xlu1 %v2693_v43, %s1946_s24 }
 0x1ef   :  { %689 = vrot.lane.b32.xlu0 %v2725_v53, %s1943_s9 }
 0x1f2   :  { %809 = vrot.lane.b32.xlu1 %v2691_v7, %s1947_s25 }
 0x1f3   :  { %723 = vrot.lane.b32.xlu0 %v2725_v53, %s1944_s22 }
 0x1f6   :  { %843 = vrot.lane.b32.xlu1 %v2691_v7, %s1948_s26 }
 0x1f7   :  { %757 = vrot.lane.b32.xlu0 %v2725_v53, %s1945_s23 }
 0x1fa   :  { %877 = vrot.lane.b32.xlu1 %v2691_v7, %s1949_s27 }
 0x1fb   :  { %791 = vrot.lane.b32.xlu0 %v2725_v53, %s1946_s24 }
 0x1fe   :  { %667 = vrot.lane.b32.xlu1 %v2743_v61, %s1943_s9 }
 0x1ff   :  { %821 = vrot.lane.b32.xlu0 %v2725_v53, %s1947_s25 }
 0x202   :  { %707 = vrot.lane.b32.xlu1 %v2743_v61, %s1944_s22 }
 0x203   :  { %817 = vrot.lane.b32.xlu0 %v2749_v63, %s1947_s25 }
 0x206   :  { %741 = vrot.lane.b32.xlu1 %v2743_v61, %s1945_s23 }
 0x207   :  { %855 = vrot.lane.b32.xlu0 %v2725_v53, %s1948_s26 }
 0x20a   :  { %775 = vrot.lane.b32.xlu1 %v2743_v61, %s1946_s24 }
 0x20b   :  { %851 = vrot.lane.b32.xlu0 %v2749_v63, %s1948_s26 }
 0x20e   :  { %811 = vrot.lane.b32.xlu1 %v2707_v62, %s1947_s25 }
 0x20f   :  { %889 = vrot.lane.b32.xlu0 %v2725_v53, %s1949_s27 }
 0x212   :  { %845 = vrot.lane.b32.xlu1 %v2707_v62, %s1948_s26 }
 0x213   :  { %885 = vrot.lane.b32.xlu0 %v2749_v63, %s1949_s27 }
 0x216   :  { %815 = vrot.lane.b32.xlu1 %v2743_v61, %s1947_s25 }
 0x217   :  { %687 = vrot.lane.b32.xlu0 %v2771_v21, %s1943_s9 }
 0x21a   :  { %879 = vrot.lane.b32.xlu1 %v2707_v62, %s1949_s27 }
 0x21b   :  { %669 = vrot.lane.b32.xlu0 %v2777_v23, %s1943_s9 }
 0x21e   :  { %849 = vrot.lane.b32.xlu1 %v2743_v61, %s1948_s26 }
 0x21f   :  { %721 = vrot.lane.b32.xlu0 %v2771_v21, %s1944_s22 }
 0x222   :  { %913 = vrot.lane.b32.xlu1 %v2707_v62, %s1950_s28 }
 0x223   :  { %709 = vrot.lane.b32.xlu0 %v2777_v23, %s1944_s22 }
 0x226   :  { %685 = vrot.lane.b32.xlu1 %v2749_v63, %s1943_s9 }
 0x227   :  { %755 = vrot.lane.b32.xlu0 %v2771_v21, %s1945_s23 }
 0x22a   :  { %719 = vrot.lane.b32.xlu1 %v2749_v63, %s1944_s22 }
 0x22b   :  { %743 = vrot.lane.b32.xlu0 %v2777_v23, %s1945_s23 }
 0x22e   :  { %753 = vrot.lane.b32.xlu1 %v2749_v63, %s1945_s23 }
 0x22f   :  { %789 = vrot.lane.b32.xlu0 %v2771_v21, %s1946_s24 }
 0x232   :  { %787 = vrot.lane.b32.xlu1 %v2749_v63, %s1946_s24 }
 0x233   :  { %777 = vrot.lane.b32.xlu0 %v2777_v23, %s1946_s24 }
 0x236   :  { %911 = vrot.lane.b32.xlu1 %v2691_v7, %s1950_s28 }
 0x237   :  { %915 = vrot.lane.b32.xlu0 %v2693_v43, %s1950_s28 }
 0x23a   :  { %819 = vrot.lane.b32.xlu1 %v2771_v21, %s1947_s25 }
 0x23b   :  { %923 = vrot.lane.b32.xlu0 %v2725_v53, %s1950_s28 }
 0x23e   :  { %853 = vrot.lane.b32.xlu1 %v2771_v21, %s1948_s26 }
 0x23f   :  { %919 = vrot.lane.b32.xlu0 %v2749_v63, %s1950_s28 }
 0x242   :  { %887 = vrot.lane.b32.xlu1 %v2771_v21, %s1949_s27 }
 0x243   :  { %823 = vrot.lane.b32.xlu0 %v2777_v23, %s1947_s25 }
 0x244   :  { %v2828_v20 = vpop.permute.xlu1 %679 }
 0x245   :  { %v2830_v27 = vpop.permute.xlu0 %813 }
 0x246   :  { %3405 = vst [vmem:[#allocation52_spill] sm:$0xff] %v2830_v27  ;;  %921 = vrot.lane.b32.xlu1 %v2771_v21, %s1950_s28 }
 0x247   :  { %857 = vrot.lane.b32.xlu0 %v2777_v23, %s1948_s26 }
 0x248   :  { %v2836_v42 = vpop.permute.xlu1 %713 }
 0x249   :  { %v2838_v48 = vpop.permute.xlu0 %847 }
 0x24a   :  { %3406 = vst [vmem:[#allocation53_spill] sm:$0xff] %v2838_v48  ;;  %883 = vrot.lane.b32.xlu1 %v2743_v61, %s1949_s27 }
 0x24b   :  { %891 = vrot.lane.b32.xlu0 %v2777_v23, %s1949_s27 }
 0x24c   :  { %v684_v4 = vpop.permute.xlu1 %683 }
 0x24d   :  { %v2844_v6 = vpop.permute.xlu0 %881 }
 0x24e   :  { %3407 = vst [vmem:[#allocation54_spill] sm:$0xff] %v2844_v6  ;;  %917 = vrot.lane.b32.xlu1 %v2743_v61, %s1950_s28 }
 0x24f   :  { %925 = vrot.lane.b32.xlu0 %v2777_v23, %s1950_s28 }
 0x250   :  { %v2850_v49 = vpop.permute.xlu1 %747 }
 0x251   :  { %v682_v19 = vpop.permute.xlu0 %681 }
 0x252   :  { %v2854_v22 = vsel %vm152_vm0, %v2828_v20, %v682_v19  ;;  %1018 = vperm.xlu1 %1918, %v2215_v36   ;;  %v692_v10 = vsel %vm152_vm0, %v682_v19, %v684_v4 }
 0x253   :  { %1022 = vperm.xlu0 %1919, %v2220_v37  }
 0x254   :  { %v718_v18 = vpop.permute.xlu1 %717 }
 0x255   :  { %v716_v51 = vpop.permute.xlu0 %715 }
 0x256   :  { %v2860_v54 = vsel %vm187_vm2, %v2836_v42, %v716_v51  ;;  %v726_v25 = vsel %vm187_vm2, %v716_v51, %v718_v18 }
 0x258   :  { %v2863_v17 = vpop.permute.xlu1 %781 }
 0x259   :  { %v750_v1 = vpop.permute.xlu0 %749 }
 0x25a   :  { %v2867_v8 = vsel %vm222_vm3, %v2850_v49, %v750_v1 }
 0x25c   :  { %v2869_v6 = vpop.permute.xlu1 %751 }
 0x25d   :  { %v2873_v36 = vsel %vm222_vm3, %v750_v1, %v2869_v6  ;;  %v784_v37 = vpop.permute.xlu0 %783 }
 0x25e   :  { %v2877_v48 = vsel %vm257_vm4, %v2863_v17, %v784_v37 }
 0x260   :  { %v2879_v9 = vpop.permute.xlu1 %785 }
 0x261   :  { %v2883_v51 = vsel %vm257_vm4, %v784_v37, %v2879_v9  ;;  %v690_v5 = vpop.permute.xlu0 %689 }
 0x262   :  { %3408 = vst [vmem:[#allocation55_spill] sm:$0xff] %v2883_v51 }
 0x264   :  { %v2885_v27 = vpop.permute.xlu1 %809 }
 0x265   :  { %3409 = vst [vmem:[#allocation56_spill] sm:$0xff] %v2885_v27  ;;  %v724_v43 = vpop.permute.xlu0 %723 }
 0x268   :  { %v2887_v32 = vpop.permute.xlu1 %843 }
 0x269   :  { %3410 = vst [vmem:[#allocation57_spill] sm:$0xff] %v2887_v32  ;;  %v2889_v7 = vpop.permute.xlu0 %757 }
 0x26c   :  { %v2891_v1 = vpop.permute.xlu1 %877 }
 0x26d   :  { %3411 = vst [vmem:[#allocation58_spill] sm:$0xff] %v2891_v1  ;;  %v2893_v40 = vpop.permute.xlu0 %791 }
 0x270   :  { %v668_v53 = vpop.permute.xlu1 %667 }
 0x271   :  { %v2895_v39 = vpop.permute.xlu0 %821  ;;  %v693_v15 = vsel %vm152_vm0, %v684_v4, %v668_v53 }
 0x272   :  { %3412 = vst [vmem:[#allocation59_spill] sm:$0xff] %v2895_v39 }
 0x274   :  { %v708_v63 = vpop.permute.xlu1 %707 }
 0x275   :  { %v2897_v41 = vpop.permute.xlu0 %817  ;;  %v727_v4 = vsel %vm187_vm2, %v718_v18, %v708_v63 }
 0x276   :  { %3413 = vst [vmem:[#allocation60_spill] sm:$0xff] %v2897_v41 }
 0x278   :  { %v2899_v37 = vpop.permute.xlu1 %741 }
 0x279   :  { %v2901_v61 = vpop.permute.xlu0 %855 }
 0x27a   :  { %3414 = vst [vmem:[#allocation61_spill] sm:$0xff] %v2901_v61 }
 0x27c   :  { %v2903_v27 = vpop.permute.xlu1 %775 }
 0x27d   :  { %v2905_v3 = vpop.permute.xlu0 %851 }
 0x27e   :  { %3415 = vst [vmem:[#allocation62_spill] sm:$0xff] %v2905_v3 }
 0x280   :  { %v2907_v32 = vpop.permute.xlu1 %811 }
 0x281   :  { %3416 = vst [vmem:[#allocation63_spill] sm:$0xff] %v2907_v32  ;;  %v2909_v62 = vpop.permute.xlu0 %889 }
 0x282   :  { %3417 = vst [vmem:[#allocation64_spill] sm:$0xff] %v2909_v62 }
 0x284   :  { %v2911_v1 = vpop.permute.xlu1 %845 }
 0x285   :  { %3418 = vst [vmem:[#allocation65_spill] sm:$0xff] %v2911_v1  ;;  %v2913_v33 = vpop.permute.xlu0 %885  ;;  %v948_v1 = vmul.f32 %v693_v15, %v2195_v28  ;;  %v705_v28 = vsel %vm152_vm0, %v668_v53, %v2828_v20  ;;  %v955_v15 = vmul.f32 %v726_v25, %v2273_v13  ;;  %v1933_v13 = vld [vmem:[%s3281_s2 + $0x20] sm:$0xff]  ;;  %v1934_v53 = vld [vmem:[%s3281_s2 + $0x28] sm:$0xff] }
 0x286   :  { %3419 = vst [vmem:[#allocation66_spill] sm:$0xff] %v2913_v33 }
 0x288   :  { %v2915_v39 = vpop.permute.xlu1 %815 }
 0x289   :  { %3420 = vst [vmem:[#allocation67_spill] sm:$0xff] %v2915_v39  ;;  %v688_v51 = vpop.permute.xlu0 %687  ;;  %v947_v39 = vmul.f32 %v692_v10, %v2205_v30  ;;  %v956_v10 = vmul.f32 %v727_v4, %v2278_v14 }
 0x28a   :  { %v695_v41 = vsel %vm152_vm0, %v688_v51, %v690_v5 }
 0x28b   :  { %v951_v32 = vmul.f32 %v695_v41, %v2210_v31 }
 0x28c   :  { %v2919_v61 = vpop.permute.xlu1 %879 }
 0x28d   :  { %3421 = vst [vmem:[#allocation68_spill] sm:$0xff] %v2919_v61  ;;  %v670_v3 = vpop.permute.xlu0 %669  ;;  %v1859_v26 = vpack.c.bf16 %v951_v32, %v947_v39  ;;  %v1932_v39 = vld [vmem:[%s3281_s2] sm:$0xff] }
 0x28e   :  { %v696_v62 = vsel %vm152_vm0, %v690_v5, %v670_v3 }
 0x28f   :  { %v952_v33 = vmul.f32 %v696_v62, %v2200_v29 }
 0x290   :  { %v2927_v46 = vpop.permute.xlu1 %849 }
 0x291   :  { %v722_v16 = vpop.permute.xlu0 %721  ;;  %v1857_v47 = vpack.c.bf16 %v952_v33, %v948_v1 }
 0x292   :  { %v729_v61 = vsel %vm187_vm2, %v722_v16, %v724_v43 }
 0x293   :  { %1858 = vmatprep.subr.bf16.mxu1 %v1857_v47  ;;  %v959_v29 = vmul.f32 %v729_v61, %v2263_v11  ;;  %v1931_v47 = vld [vmem:[%s3281_s2 + $0x8] sm:$0xff]  ;;  %v945_v11 = vmul.f32 %v1932_v39, %v705_v28  ;;  %v982_v39 = vmul.f32 %v2771_v21, %v2363_v35  ;;  %v3426_v35 = vld [vmem:[#allocation9_spill] sm:$0xff] }
 0x294   :  { %1860 = vmatpush1.bf16.msra.mxu1 %v1859_v26  ;;  %v2931_v31 = vpop.permute.xlu1 %913  ;;  %v946_v26 = vmul.f32 %v1931_v47, %v2854_v22  ;;  %v954_v22 = vmul.f32 %v2860_v54, %v2235_v50  ;;  %v773_v50 = vsel %vm222_vm3, %v2899_v37, %v2850_v49 }
 0x295   :  { %v710_v41 = vpop.permute.xlu0 %709  ;;  %v1863_v62 = vpack.c.bf16 %v959_v29, %v955_v15 }
 0x296   :  { %v730_v30 = vsel %vm187_vm2, %v724_v43, %v710_v41  ;;  %v739_v43 = vsel %vm187_vm2, %v708_v63, %v2836_v42 }
 0x297   :  { %v960_v33 = vmul.f32 %v730_v30, %v2268_v12 }
 0x298   :  { %v686_v32 = vpop.permute.xlu1 %685 }
 0x299   :  { %v694_v5 = vsel %vm152_vm0, %v686_v32, %v688_v51  ;;  %v706_v14 = vsel %vm152_vm0, %v670_v3, %v686_v32  ;;  %v756_v18 = vpop.permute.xlu0 %755  ;;  %v1861_v12 = vpack.c.bf16 %v960_v33, %v956_v10  ;;  %v761_v3 = vsel %vm222_vm3, %v2869_v6, %v2899_v37 }
 0x29a   :  { %v949_v25 = vmul.f32 %v1933_v13, %v706_v14  ;;  %v950_v61 = vmul.f32 %v1934_v53, %v694_v5  ;;  %v763_v20 = vsel %vm222_vm3, %v756_v18, %v2889_v7  ;;  %v953_v51 = vmul.f32 %v739_v43, %v2254_v59  ;;  %v3422_v5 = vld [vmem:[#allocation2_spill] sm:$0xff]  ;;  %v3429_v53 = vld [vmem:[#allocation3_spill] sm:$0xff] }
 0x29b   :  { %1862 = vmatprep.subr.bf16.mxu1 %v1861_v12  ;;  %v967_v29 = vmul.f32 %v763_v20, %v2319_v55  ;;  %v964_v59 = vmul.f32 %v761_v3, %v2334_v60  ;;  %v963_v55 = vmul.f32 %v2873_v36, %v2329_v57  ;;  %v961_v60 = vmul.f32 %v773_v50, %v2310_v45  ;;  %v3425_v43 = vld [vmem:[#allocation6_spill] sm:$0xff]  ;;  %v3431_v20 = vld [vmem:[#allocation8_spill] sm:$0xff] }
 0x29c   :  { %v1823_v63 = vpack.c.bf16 %v949_v25, %v945_v11  ;;  %1864 = vmatpush1.bf16.msra.mxu1 %v1863_v62  ;;  %v720_v42 = vpop.permute.xlu1 %719  ;;  %v1821_v19 = vpack.c.bf16 %v950_v61, %v946_v26  ;;  %v3432_v3 = vld [vmem:[#allocation50_spill] sm:$0xff]  ;;  %v3437_v50 = vld [vmem:[#allocation4_spill] sm:$0xff] }
 0x29d   :  { %v728_v1 = vsel %vm187_vm2, %v720_v42, %v722_v16  ;;  %v740_v4 = vsel %vm187_vm2, %v710_v41, %v720_v42  ;;  %v744_v28 = vpop.permute.xlu0 %743  ;;  %v1867_v37 = vpack.c.bf16 %v967_v29, %v963_v55  ;;  %v3436_v29 = vld [vmem:[#allocation49_spill] sm:$0xff]  ;;  %v3439_v55 = vld [vmem:[#allocation12_spill] sm:$0xff] }
 0x29e   :  { %v957_v30 = vmul.f32 %v740_v4, %v2249_v58  ;;  %v958_v6 = vmul.f32 %v728_v1, %v2241_v52  ;;  %v764_v10 = vsel %vm222_vm3, %v2889_v7, %v744_v28  ;;  %1822 = vmatprep.subr.bf16.mxu0 %v1821_v19  ;;  %v962_v52 = vmul.f32 %v2867_v8, %v2291_v34  ;;  %v3434_v1 = vld [vmem:[#allocation51_spill] sm:$0xff] }
 0x29f   :  { %v968_v16 = vmul.f32 %v764_v10, %v2324_v56  ;;  %1824 = vmatpush1.bf16.msra.mxu0 %v1823_v63  ;;  %v795_v34 = vsel %vm257_vm4, %v2879_v9, %v2903_v27  ;;  %v807_v8 = vsel %vm257_vm4, %v2903_v27, %v2863_v17  ;;  %v984_v9 = vmul.f32 %v2777_v23, %v2406_v2  ;;  %v3427_v2 = vld [vmem:[#allocation10_spill] sm:$0xff]  ;;  %v3428_v23 = vld [vmem:[#allocation55_spill] sm:$0xff] }
 0x2a0   :  { %v1827_v54 = vpack.c.bf16 %v957_v30, %v953_v51  ;;  %v754_v58 = vpop.permute.xlu1 %753  ;;  %v1825_v41 = vpack.c.bf16 %v958_v6, %v954_v22  ;;  %v980_v63 = vmul.f32 %v3432_v3, %v3431_v20  ;;  %v3433_v51 = vld [vmem:[#allocation5_spill] sm:$0xff] }
 0x2a1   :  { %v762_v7 = vsel %vm222_vm3, %v754_v58, %v756_v18  ;;  %v774_v33 = vsel %vm222_vm3, %v744_v28, %v754_v58  ;;  %v790_v47 = vpop.permute.xlu0 %789  ;;  %v1865_v49 = vpack.c.bf16 %v968_v16, %v964_v59  ;;  %v3424_v18 = vld [vmem:[#allocation11_spill] sm:$0xff]  ;;  %v981_v4 = vmul.f32 %v3434_v1, %v3433_v51  ;;  %v3435_v28 = vld [vmem:[#allocation13_spill] sm:$0xff]  ;;  %v3438_v59 = vld [vmem:[#allocation46_spill] sm:$0xff] }
 0x2a2   :  { %v965_v56 = vmul.f32 %v774_v33, %v2305_v44  ;;  %v966_v26 = vmul.f32 %v762_v7, %v2297_v38  ;;  %1826 = vmatprep.subr.bf16.mxu0 %v1825_v41  ;;  %v797_v57 = vsel %vm257_vm4, %v790_v47, %v2893_v40  ;;  %v970_v38 = vmul.f32 %v2877_v48, %v2347_v24  ;;  %v3423_v24 = vld [vmem:[#allocation7_spill] sm:$0xff]  ;;  %v3443_v33 = vld [vmem:[#allocation52_spill] sm:$0xff] }
 0x2a3   :  { %1828 = vmatpush1.bf16.msra.mxu0 %v1827_v54  ;;  %1866 = vmatprep.subr.bf16.mxu1 %v1865_v49  ;;  %v975_v11 = vmul.f32 %v797_v57, %v2413_v0  ;;  %v969_v48 = vmul.f32 %v807_v8, %v3423_v24  ;;  %v972_v12 = vmul.f32 %v795_v34, %v3424_v18  ;;  %v3440_v54 = vld [vmem:[#allocation47_spill] sm:$0xff]  ;;  %v3461_v1 = vld [vmem:[#allocation28_spill] sm:$0xff] }
 0x2a4   :  { %v1831_v45 = vpack.c.bf16 %v965_v56, %v961_v60  ;;  %1868 = vmatpush1.bf16.msra.mxu1 %v1867_v37  ;;  %v788_v36 = vpop.permute.xlu1 %787  ;;  %v1829_v44 = vpack.c.bf16 %v966_v26, %v962_v52  ;;  %v971_v0 = vmul.f32 %v3428_v23, %v3427_v2  ;;  %v983_v30 = vmul.f32 %v3436_v29, %v3435_v28  ;;  %v3441_v41 = vld [vmem:[#allocation63_spill] sm:$0xff]  ;;  %v3442_v52 = vld [vmem:[#allocation56_spill] sm:$0xff] }
 0x2a5   :  { %v796_v15 = vsel %vm257_vm4, %v788_v36, %v790_v47  ;;  %v778_v32 = vpop.permute.xlu0 %777  ;;  %v977_v16 = vmul.f32 %v3438_v59, %v3437_v50  ;;  %v979_v58 = vmul.f32 %v3440_v54, %v3439_v55  ;;  %v825_v7 = vsel %vm290_vm5, %v3442_v52, %v3441_v41  ;;  %v3444_v37 = vld [vmem:[#allocation60_spill] sm:$0xff]  ;;  %v3445_v26 = vld [vmem:[#allocation59_spill] sm:$0xff]  ;;  %v3465_v59 = vld [vmem:[#allocation33_spill] sm:$0xff] }
 0x2a6   :  { %v974_v17 = vmul.f32 %v796_v15, %v3422_v5  ;;  %v798_v27 = vsel %vm257_vm4, %v2893_v40, %v778_v32  ;;  %v808_v14 = vsel %vm257_vm4, %v778_v32, %v788_v36  ;;  %1830 = vmatprep.subr.bf16.mxu0 %v1829_v44  ;;  %v3430_v40 = vld [vmem:[#allocation48_spill] sm:$0xff]  ;;  %v1871_v6 = vpack.c.bf16 %v975_v11, %v971_v0  ;;  %v3446_v36 = vld [vmem:[#allocation17_spill] sm:$0xff]  ;;  %v3456_v0 = vld [vmem:[#allocation54_spill] sm:$0xff] }
 0x2a7   :  { %v973_v62 = vmul.f32 %v808_v14, %v3425_v43  ;;  %v976_v21 = vmul.f32 %v798_v27, %v3426_v35  ;;  %1832 = vmatpush1.bf16.msra.mxu0 %v1831_v45  ;;  %v978_v61 = vmul.f32 %v3430_v40, %v3429_v53  ;;  %v826_v47 = vsel %vm290_vm5, %v3441_v41, %v3443_v33  ;;  %v3448_v32 = vld [vmem:[#allocation20_spill] sm:$0xff]  ;;  %v3450_v5 = vld [vmem:[#allocation65_spill] sm:$0xff]  ;;  %v3457_v53 = vld [vmem:[#allocation62_spill] sm:$0xff] }
 0x2a8   :  { %v3012_v13 = vpop.permute.xlu1 %911  ;;  %v1833_v25 = vpack.c.bf16 %v974_v17, %v970_v38  ;;  %v1873_v49 = vpack.c.bf16 %v984_v9, %v980_v63  ;;  %v1839_v8 = vpack.c.bf16 %v981_v4, %v977_v16  ;;  %v1875_v45 = vpack.c.bf16 %v983_v30, %v979_v58  ;;  %v3447_v38 = vld [vmem:[#allocation14_spill] sm:$0xff]  ;;  %v3449_v9 = vld [vmem:[#allocation15_spill] sm:$0xff]  ;;  %v3451_v17 = vld [vmem:[#allocation57_spill] sm:$0xff] }
 0x2a9   :  { %v1835_v42 = vpack.c.bf16 %v973_v62, %v969_v48  ;;  %v3018_v19 = vpop.permute.xlu0 %915  ;;  %v1869_v22 = vpack.c.bf16 %v976_v21, %v972_v12  ;;  %v1837_v10 = vpack.c.bf16 %v982_v39, %v978_v61  ;;  %v985_v44 = vmul.f32 %v825_v7, %v3446_v36  ;;  %v3452_v14 = vld [vmem:[#allocation53_spill] sm:$0xff]  ;;  %v3453_v48 = vld [vmem:[#allocation67_spill] sm:$0xff]  ;;  %v3454_v43 = vld [vmem:[#allocation68_spill] sm:$0xff] }
 0x2aa   :  { %1834 = vmatprep.subr.bf16.mxu0 %v1833_v25  ;;  %v986_v15 = vmul.f32 %v826_v47, %v3447_v38  ;;  %v859_v27 = vsel %vm325_vm6, %v3451_v17, %v3450_v5  ;;  %v860_v24 = vsel %vm325_vm6, %v3450_v5, %v3452_v14  ;;  %v827_v18 = vsel %vm290_vm5, %v3443_v33, %v3453_v48  ;;  %v3455_v62 = vld [vmem:[#allocation58_spill] sm:$0xff]  ;;  %v3458_v61 = vld [vmem:[#allocation61_spill] sm:$0xff]  ;;  %v3462_v28 = vld [vmem:[#allocation23_spill] sm:$0xff] }
 0x2ab   :  { %1836 = vmatpush1.bf16.msra.mxu0 %v1835_v42  ;;  %1870 = vmatprep.subr.bf16.mxu1 %v1869_v22  ;;  %v841_v12 = vsel %vm290_vm5, %v3453_v48, %v3442_v52  ;;  %v893_v35 = vsel %vm360_vm7, %v3455_v62, %v3454_v43  ;;  %v894_v25 = vsel %vm360_vm7, %v3454_v43, %v3456_v0  ;;  %v3459_v63 = vld [vmem:[#allocation25_spill] sm:$0xff]  ;;  %v3460_v22 = vld [vmem:[#allocation22_spill] sm:$0xff]  ;;  %v3463_v30 = vld [vmem:[#allocation16_spill] sm:$0xff] }
 0x2ac   :  { %1838 = vmatprep.subr.bf16.mxu0 %v1837_v10  ;;  %1872 = vmatpush1.bf16.msra.mxu1 %v1871_v6  ;;  %v820_v60 = vpop.permute.xlu1 %819  ;;  %v993_v42 = vmul.f32 %v859_v27, %v3459_v63  ;;  %v994_v51 = vmul.f32 %v860_v24, %v3460_v22  ;;  %v987_v6 = vmul.f32 %v827_v18, %v3463_v30  ;;  %v3464_v10 = vld [vmem:[#allocation18_spill] sm:$0xff]  ;;  %v3473_v27 = vld [vmem:[#allocation21_spill] sm:$0xff] }
 0x2ad   :  { %v828_v56 = vsel %vm290_vm5, %v3444_v37, %v820_v60  ;;  %v829_v57 = vsel %vm290_vm5, %v820_v60, %v3445_v26  ;;  %v3038_v34 = vpop.permute.xlu0 %923  ;;  %1874 = vmatprep.subr.bf16.mxu1 %v1873_v49  ;;  %v988_v50 = vmul.f32 %v841_v12, %v3464_v10  ;;  %v1001_v16 = vmul.f32 %v893_v35, %v3465_v59  ;;  %v3466_v55 = vld [vmem:[#allocation30_spill] sm:$0xff]  ;;  %v3474_v24 = vld [vmem:[#allocation41_spill] sm:$0xff] }
 0x2ae   :  { %v989_v39 = vmul.f32 %v828_v56, %v3448_v32  ;;  %v990_v11 = vmul.f32 %v829_v57, %v3449_v9  ;;  %v1002_v54 = vmul.f32 %v894_v25, %v3466_v55  ;;  %v861_v58 = vsel %vm325_vm6, %v3452_v14, %v2927_v46  ;;  %v3467_v49 = vld [vmem:[#allocation66_spill] sm:$0xff]  ;;  %v3468_v56 = vld [vmem:[#allocation64_spill] sm:$0xff] }
 0x2af   :  { %1840 = vmatpush1.bf16.msra.mxu0 %v1839_v8  ;;  %v927_v33 = vsel %vm395_vm8, %v3012_v13, %v2931_v31  ;;  %v928_v47 = vsel %vm395_vm8, %v2931_v31, %v3018_v19  ;;  %v875_v31 = vsel %vm325_vm6, %v2927_v46, %v3451_v17  ;;  %v3475_v18 = vld [vmem:[#allocation38_spill] sm:$0xff]  ;;  %v3481_v55 = vld [vmem:[#allocation32_spill] sm:$0xff] }
 0x2b0   :  { %v1843_v21 = vpack.c.bf16 %v989_v39, %v985_v44  ;;  %1876 = vmatpush1.bf16.msra.mxu1 %v1875_v45  ;;  %v854_v2 = vpop.permute.xlu1 %853  ;;  %v1841_v23 = vpack.c.bf16 %v990_v11, %v986_v15  ;;  %v3469_v45 = vld [vmem:[#allocation36_spill] sm:$0xff]  ;;  %v3470_v44 = vld [vmem:[#allocation31_spill] sm:$0xff]  ;;  %v1009_v48 = vmul.f32 %v927_v33, %v3474_v24  ;;  %v1010_v12 = vmul.f32 %v928_v47, %v3475_v18  ;;  %v3478_v22 = vld [vmem:[#allocation26_spill] sm:$0xff] }
 0x2b1   :  { %v862_v40 = vsel %vm325_vm6, %v3457_v53, %v854_v2  ;;  %v863_v20 = vsel %vm325_vm6, %v854_v2, %v3458_v61  ;;  %v3066_v3 = vpop.permute.xlu0 %919  ;;  %v3471_v39 = vld [vmem:[#allocation24_spill] sm:$0xff]  ;;  %v3472_v11 = vld [vmem:[#allocation19_spill] sm:$0xff] }
 0x2b2   :  { %v997_v4 = vmul.f32 %v862_v40, %v3461_v1  ;;  %v998_v29 = vmul.f32 %v863_v20, %v3462_v28  ;;  %1842 = vmatprep.subr.bf16.mxu0 %v1841_v23  ;;  %v995_v9 = vmul.f32 %v861_v58, %v3471_v39  ;;  %v3476_v23 = vld [vmem:[#allocation44_spill] sm:$0xff]  ;;  %v3477_v40 = vld [vmem:[#allocation39_spill] sm:$0xff]  ;;  %v3480_v28 = vld [vmem:[#allocation29_spill] sm:$0xff] }
 0x2b3   :  { %1844 = vmatpush1.bf16.msra.mxu0 %v1843_v21  ;;  %v3479_v1 = vld [vmem:[#allocation27_spill] sm:$0xff]  ;;  %v3482_v58 = vld [vmem:[#allocation34_spill] sm:$0xff] }
 0x2b4   :  { %v1847_v41 = vpack.c.bf16 %v997_v4, %v993_v42  ;;  %v888_v52 = vpop.permute.xlu1 %887  ;;  %v1845_v7 = vpack.c.bf16 %v998_v29, %v994_v51  ;;  %v996_v51 = vmul.f32 %v875_v31, %v3478_v22  ;;  %v3483_v33 = vld [vmem:[#allocation35_spill] sm:$0xff] }
 0x2b5   :  { %v896_v60 = vsel %vm360_vm7, %v3467_v49, %v888_v52  ;;  %v897_v57 = vsel %vm360_vm7, %v888_v52, %v3468_v56  ;;  %v824_v8 = vpop.permute.xlu0 %823 }
 0x2b6   :  { %v1005_v36 = vmul.f32 %v896_v60, %v3469_v45  ;;  %v1006_v38 = vmul.f32 %v897_v57, %v3470_v44  ;;  %v830_v15 = vsel %vm290_vm5, %v3445_v26, %v824_v8  ;;  %v842_v32 = vsel %vm290_vm5, %v824_v8, %v3444_v37  ;;  %1846 = vmatprep.subr.bf16.mxu0 %v1845_v7  ;;  %v3484_v60 = vld [vmem:[#allocation37_spill] sm:$0xff] }
 0x2b7   :  { %v991_v5 = vmul.f32 %v830_v15, %v3472_v11  ;;  %v992_v14 = vmul.f32 %v842_v32, %v3473_v27  ;;  %1848 = vmatpush1.bf16.msra.mxu0 %v1847_v41  ;;  %v3486_v32 = vld [vmem:[#allocation42_spill] sm:$0xff]  ;;  %v3487_v11 = vld [vmem:[#allocation43_spill] sm:$0xff]  ;;  %v3488_v27 = vld [vmem:[#allocation45_spill] sm:$0xff] }
 0x2b8   :  { %v1851_v26 = vpack.c.bf16 %v1005_v36, %v1001_v16  ;;  %v922_v43 = vpop.permute.xlu1 %921  ;;  %v1849_v35 = vpack.c.bf16 %v1006_v38, %v1002_v54  ;;  %v3485_v38 = vld [vmem:[#allocation40_spill] sm:$0xff] }
 0x2b9   :  { %v1879_v37 = vpack.c.bf16 %v991_v5, %v987_v6  ;;  %v930_v21 = vsel %vm395_vm8, %v3066_v3, %v922_v43  ;;  %v931_v46 = vsel %vm395_vm8, %v922_v43, %v3038_v34  ;;  %v858_v17 = vpop.permute.xlu0 %857  ;;  %v1877_v2 = vpack.c.bf16 %v992_v14, %v988_v50 }
 0x2ba   :  { %v1013_v25 = vmul.f32 %v930_v21, %v3476_v23  ;;  %v1014_v20 = vmul.f32 %v931_v46, %v3477_v40  ;;  %v864_v63 = vsel %vm325_vm6, %v3458_v61, %v858_v17  ;;  %v876_v42 = vsel %vm325_vm6, %v858_v17, %v3457_v53  ;;  %1850 = vmatprep.subr.bf16.mxu0 %v1849_v35  ;;  %v111_v21 = vld [vmem:[%s3284_s3 + $0x10] sm:$0xff] }
 0x2bb   :  { %v999_v4 = vmul.f32 %v864_v63, %v3479_v1  ;;  %v1000_v29 = vmul.f32 %v876_v42, %v3480_v28  ;;  %1852 = vmatpush1.bf16.msra.mxu0 %v1851_v26  ;;  %1878 = vmatprep.subr.bf16.mxu1 %v1877_v2  ;;  %v1955_v28 = vmov 0.0  }
 0x2bc   :  { %v1855_v30 = vpack.c.bf16 %v1013_v25, %v1009_v48  ;;  %1880 = vmatpush1.bf16.msra.mxu1 %v1879_v37  ;;  %v884_v6 = vpop.permute.xlu1 %883  ;;  %v1853_v10 = vpack.c.bf16 %v1014_v20, %v1010_v12  ;;  %v112_v48 = vld [vmem:[%s3284_s3 + $0x18] sm:$0xff] }
 0x2bd   :  { %v1883_v50 = vpack.c.bf16 %v999_v4, %v995_v9  ;;  %v895_v61 = vsel %vm360_vm7, %v3456_v0, %v884_v6  ;;  %v909_v53 = vsel %vm360_vm7, %v884_v6, %v3455_v62  ;;  %v892_v59 = vpop.permute.xlu0 %891  ;;  %v1881_v16 = vpack.c.bf16 %v1000_v29, %v996_v51  ;;  %v117_v62 = vld [vmem:[%s3282_s4 + $0x20] sm:$0xff] }
 0x2be   :  { %v1003_v54 = vmul.f32 %v895_v61, %v3481_v55  ;;  %v1004_v41 = vmul.f32 %v909_v53, %v3482_v58  ;;  %v898_v52 = vsel %vm360_vm7, %v3468_v56, %v892_v59  ;;  %v910_v7 = vsel %vm360_vm7, %v892_v59, %v3467_v49  ;;  %1854 = vmatprep.subr.bf16.mxu0 %v1853_v10  ;;  %v120_v56 = vld [vmem:[%s3282_s4 + $0x38] sm:$0xff]  ;;  %v123_v29 = vld [vmem:[%s3285_s6] sm:$0xf]  ;;  %v1338_v58 = vld [vmem:[%s3286_s1 + $0x8] sm:$0xff] }
 0x2bf   :  { %v1007_v47 = vmul.f32 %v898_v52, %v3483_v33  ;;  %v1008_v0 = vmul.f32 %v910_v7, %v3484_v60  ;;  %1856 = vmatpush1.bf16.msra.mxu0 %v1855_v30  ;;  %1882 = vmatprep.subr.bf16.mxu1 %v1881_v16  ;;  %v1953_v4 = vmov 0.0|0.0   ;;  %v1956_v30 = vmov 16   ;;  %v125_v60 = vld [vmem:[%s3287_s7 + $0x8] sm:$0xff] }
 0x2c0   :  { %1884 = vmatpush1.bf16.msra.mxu1 %v1883_v50  ;;  %v918_v57 = vpop.permute.xlu1 %917  ;;  %1920 = vset.pattern.permute.xlu1 %v1956_v30 }
 0x2c1   :  { %v1887_v8 = vpack.c.bf16 %v1007_v47, %v1003_v54  ;;  %v929_v49 = vsel %vm395_vm8, %v3018_v19, %v918_v57  ;;  %v943_v45 = vsel %vm395_vm8, %v918_v57, %v3012_v13  ;;  %v926_v36 = vpop.permute.xlu0 %925  ;;  %v1885_v44 = vpack.c.bf16 %v1008_v0, %v1004_v41  ;;  %v119_v13 = vld [vmem:[%s3282_s4 + $0x30] sm:$0xff]  ;;  %1343 = vperm.xlu1 %1920, %v123_v29   ;;  %v1337_v54 = vld [vmem:[%s3286_s1] sm:$0xff] }
 0x2c2   :  { %v1011_v15 = vmul.f32 %v929_v49, %v3485_v38  ;;  %v1012_v31 = vmul.f32 %v943_v45, %v3486_v32  ;;  %v932_v39 = vsel %vm395_vm8, %v3038_v34, %v926_v36  ;;  %v944_v9 = vsel %vm395_vm8, %v926_v36, %v3066_v3  ;;  %1096 = vmatmul.mubr.f32.vlgmr.msra.gmra.mrb[4].mxu0 %v117_v62  ;;  %v3154_v34 = vld [vmem:[%s3284_s3 + $0x8] sm:$0xff]  ;;  %v3160_v3 = vld [vmem:[%s3284_s3] sm:$0xff] }
 0x2c3   :  { %v1015_v5 = vmul.f32 %v932_v39, %v3487_v11  ;;  %v1016_v19 = vmul.f32 %v944_v9, %v3488_v27  ;;  %1886 = vmatprep.subr.bf16.mxu1 %v1885_v44  ;;  %1718 = vmatprep.mubr.msk.f32.mxu0 %vm496_vm1, %v120_v56  ;;  %v124_v47 = vld [vmem:[%s3287_s7] sm:$0xff]  ;;  %v1957_v0 = vmov 4  }
 0x2c4   :  { %1888 = vmatpush1.bf16.msra.mxu1 %v1887_v8  ;;  %1185 = vmatprep.subr.mxu0 %v3154_v34 }
 0x2c5   :  { %v1891_v14 = vpack.c.bf16 %v1015_v5, %v1011_v15  ;;  %v1889_v24 = vpack.c.bf16 %v1016_v19, %v1012_v31  ;;  %1921 = vset.pattern.permute.xlu1 %v1957_v0  ;;  %1922 = vset.pattern.permute.xlu0 %v1957_v0 }
 0x2c6   :  { %1102 = vmatmul.mubr.f32.gmra.mrb[6].mxu0 %v119_v13  ;;  %1421 = vperm.xlu1 %1921, %v124_v47  }
 0x2c7   :  { %1890 = vmatprep.subr.bf16.mxu1 %v1889_v24  ;;  %1426 = vperm.xlu0 %1922, %v125_v60  }
 0x2c8   :  { %1892 = vmatpush1.bf16.msra.mxu1 %v1891_v14  ;;  %1186 = vmatpush1.xpose.msra.mxu0 %v3160_v3 }
 0x2c9   :  { %1896 = vmatprep.subr.mxu1 %v3154_v34  ;;  %1260 = vmatprep.subr.mxu0 %v112_v48 }
 0x2cb   :  { %1173 = vmatmul.mubr.f32.vlgmr.msra.gmra.mrb[4].mxu1 %v117_v62 }
 0x2cc   :  { %1720 = vmatprep.mubr.msk.f32.mxu1 %vm496_vm1, %v120_v56 }
 0x2cf   :  { %1179 = vmatmul.mubr.f32.gmra.mrb[6].mxu1 %v119_v13 }
 0x2d1   :  { %1897 = vmatpush1.xpose.msra.mxu1 %v3160_v3  ;;  %v1019_v18 = vpop.permute.xlu1 %1018 }
 0x2d2   :  { %v1023_v37 = vpop.permute.xlu0 %1022  ;;  %1893 = vmatprep.subr.bf16.mxu1 %v1953_v4 }
 0x340   :  { %v1344_v62 = vpop.permute.xlu1 %1343 }
 0x345   :  { %v1422_v36 = vpop.permute.xlu1 %1421 }
 0x346   :  { %v1427_v45 = vpop.permute.xlu0 %1426 }
 0x395   :  { %v1097_v12 = vpop.f32.mrb[4].mxu0 }
 0x396   :  { %v3168_v26 = vadd.f32 %v1097_v12, %v1019_v18  ;;  %v1099_v43 = vpop.f32.mrb[5].mxu0 }
 0x397   :  { %v3170_v35 = vadd.f32 %v1099_v43, %v1019_v18 }
 0x399   :  { %1249 = vmatprep.mubr.f32.mxu0 %v3170_v35  ;;  %v1103_v46 = vpop.f32.mrb[6].mxu0 }
 0x39a   :  { %1250 = vmatmul.mubr.f32.vlgmr.msra.gmra.mrb[8].mxu0 %v3168_v26  ;;  %v3177_v17 = vadd.f32 %v1103_v46, %v1023_v37  ;;  %v1105_v2 = vpop.f32.mrb[7].mxu0  ;;  %v1936_v46 = vld [vmem:[%s3280_s0 + $0x10] sm:$0xff] }
 0x39b   :  { %1261 = vmatpush1.xpose.msra.mxu0 %v111_v21  ;;  %v3179_v23 = vadd.f32 %v1105_v2, %v1023_v37 }
 0x39c   :  { %1608 = vmatprep.subr.mxu0 %v112_v48 }
 0x39d   :  { %1254 = vmatprep.mubr.f32.mxu1 %v3179_v23 }
 0x39e   :  { %v1174_v25 = vpop.f32.mrb[4].mxu1  ;;  %1255 = vmatmul.mubr.f32.vlgmr.msra.gmra.mrb[8].mxu1 %v3177_v17 }
 0x39f   :  { %v1176_v40 = vpop.f32.mrb[5].mxu1  ;;  %v3185_v63 = vadd.f32 %v1174_v25, %v1019_v18  ;;  %1741 = vmatprep.mubr.msk.f32.mxu1 %vm1954_vm9, %v1955_v28 }
 0x3a0   :  { %v3183_v20 = vadd.f32 %v1176_v40, %v1019_v18 }
 0x3a2   :  { %v1180_v42 = vpop.f32.mrb[6].mxu1  ;;  %1324 = vmatprep.mubr.f32.mxu0 %v3183_v20 }
 0x3a3   :  { %v1182_v22 = vpop.f32.mrb[7].mxu1  ;;  %1325 = vmatmul.mubr.f32.vlgmr.msra.gmra.mrb[8].mxu0 %v3185_v63  ;;  %v3191_v1 = vadd.f32 %v1180_v42, %v1023_v37 }
 0x3a4   :  { %v3189_v51 = vadd.f32 %v1182_v22, %v1023_v37  ;;  %1609 = vmatpush1.msra.mxu0 %v111_v21  ;;  %v1935_v37 = vld [vmem:[%s3280_s0] sm:$0xff] }
 0x3a6   :  { %1329 = vmatprep.mubr.f32.mxu0 %v3189_v51 }
 0x3a7   :  { %1330 = vmatmul.mubr.f32.gmra.mrb[10].mxu0 %v3191_v1 }
 0x3a8   :  { %1672 = vmatprep.mubr.f32.mxu0 %v1955_v28 }
 0x471   :  { %v1256_v6 = vpop.f32.mrb[8].mxu1 }
 0x472   :  { %v1258_v10 = vpop.f32.mrb[9].mxu1 }
 0x476   :  { %v1326_v50 = vpop.f32.mrb[8].mxu0 }
 0x477   :  { %v1328_v61 = vpop.f32.mrb[9].mxu0  ;;  %v1335_v59 = vmul.f32 0.015625, %v1326_v50  ;;  %v1941_v50 = vld [vmem:[%s3280_s0 + $0x28] sm:$0xff] }
 0x479   :  { %v1339_v52 = vadd.f32 %v1337_v54, %v1335_v59 }
 0x47a   :  { %v1331_v53 = vpop.f32.mrb[10].mxu0 }
 0x47b   :  { %v1332_v16 = vadd.f32 %v1331_v53, %v1256_v6  ;;  %v1333_v55 = vpop.f32.mrb[11].mxu0 }
 0x47d   :  { %v1336_v41 = vmul.f32 0.015625, %v1332_v16 }
 0x47f   :  { %v1340_v7 = vadd.f32 %v1338_v58, %v1336_v41 }
 0x481   :  { %v1894_v33 = vpack.c.bf16 %v1340_v7, %v1339_v52 }
 0x483   :  { %1895 = vmatpush3.bf16.msra.mxu1 %v1894_v33 }
 0x486   :  { %1742 = vmatmul.mubr.msk.f32.vlgmr.msra.gmra.mrb[10].mxu1 %vm496_vm1, %v123_v29 }
 0x487   :  { %1746 = vmatprep.mubr.msk.f32.mxu1 %vm1429_vm10, %v124_v47 }
 0x559   :  { %v1414_v57 = vpop.f32.mrb[10].mxu1 }
 0x55a   :  { %v1415_v56 = vadd.f32 %v1414_v57, %v1344_v62  ;;  %v1743_v8 = vpop.f32.mrb[11].mxu1 }
 0x55c   :  { %v1418_v49 = vmax.f32 %v1415_v56, 0.0 }
 0x55e   :  { %1744 = vmatprep.subr.msk.mxu1 %vm1434_vm11, %v1418_v49 }
 0x55f   :  { %1745 = vmatpush3.msk.msra.mxu1 %vm1434_vm11, %v1418_v49 }
 0x560   :  { %1747 = vmatmul.mubr.msk.f32.vlgmr.msra.gmra.mrb[12].mxu1 %vm1429_vm10, %v125_v60  ;;  %1531 = vmatprep.subr.mxu1 %v3154_v34 }
 0x561   :  { %1532 = vmatpush1.msra.mxu1 %v3160_v3  ;;  %1595 = vmatprep.mubr.f32.mxu1 %v1955_v28 }
 0x633   :  { %v1748_v44 = vpop.f32.mrb[12].mxu1 }
 0x634   :  { %v1504_v38 = vpop.f32.mrb[13].mxu1  ;;  %v1510_v15 = vadd.f32 %v1748_v44, %v1427_v45 }
 0x635   :  { %v1505_v32 = vadd.f32 %v1504_v38, %v1422_v36 }
 0x636   :  { %v1726_v31 = vmul.f32 -1.442695, %v1510_v15 }
 0x637   :  { %v1725_v39 = vmul.f32 -1.442695, %v1505_v32 }
 0x638   :  { %1923 = vpow2.f32 %v1726_v31 }
 0x639   :  { %1925 = vpow2.f32 %v1725_v39 }
 0x642   :  { %v1924_v9 = vpop.eup %1923 }
 0x643   :  { %v1926_v11 = vpop.eup %1925  ;;  %v1520_v27 = vadd.f32 1.0, %v1924_v9 }
 0x644   :  { %v1519_v5 = vadd.f32 1.0, %v1926_v11 }
 0x646   :  { %1927 = vrcp.f32 %v1519_v5 }
 0x647   :  { %1929 = vrcp.f32 %v1520_v27 }
 0x650   :  { %v1928_v19 = vpop.eup %1927 }
 0x651   :  { %1727 = vmatmul.mubr.msk.f32.vlgmr.msra.gmra.mrb[14].mxu1 %vm187_vm2, %v1928_v19  ;;  %1729 = vmatmul.mubr.msk.f32.vlgmr.msra.gmra.mrb[12].mxu0 %vm187_vm2, %v1928_v19  ;;  %v1930_v13 = vpop.eup %1929 }
 0x652   :  { %1601 = vmatprep.mubr.f32.mxu1 %v1955_v28  ;;  %1678 = vmatprep.mubr.f32.mxu0 %v1955_v28 }
 0x655   :  { %1728 = vmatmul.mubr.msk.f32.gmra.mrb[16].mxu1 %vm187_vm2, %v1930_v13  ;;  %1730 = vmatmul.mubr.msk.f32.gmra.mrb[14].mxu0 %vm187_vm2, %v1930_v13 }
 0x724   :  { %v1597_v14 = vpop.f32.mrb[14].mxu1  ;;  %v1674_v24 = vpop.f32.mrb[12].mxu0 }
 0x725   :  { %v1685_v34 = vmul.f32 %v1597_v14, %v3168_v26  ;;  %v1687_v3 = vmul.f32 %v1674_v24, %v3185_v63  ;;  %v1599_v48 = vpop.f32.mrb[15].mxu1  ;;  %v1676_v18 = vpop.f32.mrb[13].mxu0  ;;  %v1937_v26 = vld [vmem:[%s3280_s0 + $0x8] sm:$0xff] }
 0x726   :  { %v1686_v12 = vmul.f32 %v1599_v48, %v3170_v35  ;;  %v1688_v43 = vmul.f32 %v1676_v18, %v3183_v20  ;;  %v1938_v35 = vld [vmem:[%s3280_s0 + $0x18] sm:$0xff] }
 0x727   :  { %v1693_v21 = vadd.f32 %v1935_v37, %v1685_v34  ;;  %v1695_v2 = vadd.f32 %v1936_v46, %v1687_v3 }
 0x728   :  { %v1694_v25 = vadd.f32 %v1937_v26, %v1686_v12  ;;  %v1696_v40 = vadd.f32 %v1938_v35, %v1688_v43  ;;  %v1603_v20 = vpop.f32.mrb[16].mxu1  ;;  %v1680_v63 = vpop.f32.mrb[14].mxu0 }
 0x729   :  { %1701 = vst [vmem:[%s3288_s8] sm:$0xff] %v1693_v21  ;;  %1703 = vst [vmem:[%s3288_s8 + $0x10] sm:$0xff] %v1695_v2  ;;  %v1689_v42 = vmul.f32 %v1603_v20, %v3177_v17  ;;  %v1691_v22 = vmul.f32 %v1680_v63, %v3191_v1  ;;  %v1605_v4 = vpop.f32.mrb[17].mxu1  ;;  %v1682_v28 = vpop.f32.mrb[15].mxu0  ;;  %v1939_v17 = vld [vmem:[%s3280_s0 + $0x20] sm:$0xff]  ;;  %v1940_v1 = vld [vmem:[%s3280_s0 + $0x30] sm:$0xff] }
 0x72a   :  { %1702 = vst [vmem:[%s3288_s8 + $0x8] sm:$0xff] %v1694_v25  ;;  %1704 = vst [vmem:[%s3288_s8 + $0x18] sm:$0xff] %v1696_v40  ;;  %v1690_v29 = vmul.f32 %v1605_v4, %v3179_v23  ;;  %v1692_v30 = vmul.f32 %v1682_v28, %v3189_v51  ;;  %v1942_v23 = vld [vmem:[%s3280_s0 + $0x38] sm:$0xff] }
 0x72b   :  { %v1697_v6 = vadd.f32 %v1939_v17, %v1689_v42  ;;  %v1699_v10 = vadd.f32 %v1940_v1, %v1691_v22 }
 0x72c   :  { %v1698_v61 = vadd.f32 %v1941_v50, %v1690_v29  ;;  %v1700_v51 = vadd.f32 %v1942_v23, %v1692_v30 }
 0x72d   :  { %1705 = vst [vmem:[%s3288_s8 + $0x20] sm:$0xff] %v1697_v6  ;;  %1707 = vst [vmem:[%s3288_s8 + $0x30] sm:$0xff] %v1699_v10 }
 0x72e   :  { %1706 = vst [vmem:[%s3288_s8 + $0x28] sm:$0xff] %v1698_v61  ;;  %1708 = vst [vmem:[%s3288_s8 + $0x38] sm:$0xff] %v1700_v51 }

</bundles_post_ra>
